<compile_context>
chip_gen: v6e
topology: v6e:2x2x1
jax: 0.10.0
libtpu: 0.0.40
codegen_flags: <defaults>
</compile_context>

<pallas_src>
import functools

import jax
import jax.numpy as jnp
from jax import lax
from jax.experimental import pallas as pl
from jax.experimental.pallas import tpu as pltpu


# --------------------------------------------------------------------------
# Tiling / VMEM helpers
# --------------------------------------------------------------------------
def _round_up(v, m):
    return ((v + m - 1) // m) * m


def _pick_query_tile(n, max_tile=512):
    """Largest divisor of n <= max_tile that keeps the sublane dim % 8 == 0
    (or the full extent, which is always a legal BlockSpec dim)."""
    for t in range(min(n, max_tile), 0, -1):
        if n % t == 0 and (t % 8 == 0 or t == n):
            return t
    return n


def _pick_batch_block(b, max_bb=8):
    for t in range(min(b, max_bb), 0, -1):
        if b % t == 0:
            return t
    return 1


def _vmem_capacity_bytes():
    try:
        info = pltpu.get_tpu_info()
        cap = getattr(info, "vmem_capacity_bytes", None)
        if cap:
            return int(cap)
    except Exception:
        pass
    return 64 << 20  # conservative default (v7x physical VMEM)


def _vmem_limit(*nbytes):
    est = int(sum(int(b) for b in nbytes))
    # 2x for double-buffering + headroom; never request more than ~85% of
    # physical VMEM (room for Mosaic internal scratch / semaphores / spill).
    cap = int(_vmem_capacity_bytes() * 0.85)
    want = 2 * est + (8 << 20)
    return int(max(min(want, cap), min(32 << 20, cap)))


# --------------------------------------------------------------------------
# Kernel helpers
# --------------------------------------------------------------------------
def _attend_accumulate(q, k, v, wproj_ref, *, num_heads):
    """q:(M,C), k,v:(Nr,C) in compute dtype. Returns (M,C) float32.

    Heads are accumulated into a single f32 accumulator through row-slices of
    wproj so only one head's intermediates stay live (vreg pressure) and every
    store is lane-dense at width C.  The attention scale is already folded
    into q (via wq) by the wrapper.
    """
    cdt = q.dtype
    M, C = q.shape
    hd = C // num_heads

    acc = jnp.zeros((M, C), jnp.float32)
    for h in range(num_heads):
        qh = q[:, h * hd:(h + 1) * hd]                                 # (M, hd)
        kh = k[:, h * hd:(h + 1) * hd]                                 # (Nr, hd)
        vh = v[:, h * hd:(h + 1) * hd]                                 # (Nr, hd)
        s = lax.dot_general(qh, kh, (((1,), (1,)), ((), ())),
                            preferred_element_type=jnp.float32)        # (M, Nr)
        s = s - jnp.max(s, axis=-1, keepdims=True)
        e = jnp.exp(s)
        inv = pl.reciprocal(jnp.sum(e, axis=-1, keepdims=True), approx=True)
        a = (e * inv).astype(cdt)
        # TODO(synk): attn_drop / proj_drop are identity (p=0.0, eval mode).
        oh = jnp.dot(a, vh, preferred_element_type=jnp.float32).astype(cdt)
        acc = acc + jnp.dot(oh, wproj_ref[pl.ds(h * hd, hd), :],
                            preferred_element_type=jnp.float32)
    return acc


def _kv_producer_kernel(x_ref, wsr_ref, bsr_ref, wk_ref, bk_ref, wv_ref,
                        bv_ref, k_ref, v_ref, *, sr, ln_eps):
    """grid=(B,). Strided conv (kernel=stride=sr) + LayerNorm + k/v projection.

    x_ref : (1, Hr, sr, Wr, sr*C)  per-batch image (channels-last) viewed so
            that for a fixed (hr, ki) the (Wr, sr*C) slab is exactly the
            (kj, ci)-flattened conv input for output row hr -- contiguous in
            HBM, so no patches array is ever materialized.
    wsr_ref: (sr, sr*C, C)  conv weight grouped by ki (row index = kj*C + ci)
    bsr_ref: (1, C) f32     conv bias
    wk/wv :  (C, C)         kv projections with LayerNorm gamma folded in
    bk/bv :  (1, C) f32     beta @ wk  /  beta @ wv
    k_ref, v_ref: (1, Nr, C) outputs (compute dtype)
    """
    cdt = x_ref.dtype
    _, Hr, _, Wr, _ = x_ref.shape
    C = k_ref.shape[-1]

    for hr in range(Hr):                       # static unroll (Hr is small)
        acc = jnp.zeros((Wr, C), jnp.float32)
        for ki in range(sr):
            xi = x_ref[0, hr, ki, :, :]        # (Wr, sr*C)
            acc = acc + jnp.dot(xi, wsr_ref[ki],
                                preferred_element_type=jnp.float32)
        acc = acc + bsr_ref[...]
        # LayerNorm (affine folded into wk/wv by the wrapper).
        mean = jnp.mean(acc, axis=-1, keepdims=True)
        var = jnp.mean(jnp.square(acc - mean), axis=-1, keepdims=True)
        xn = ((acc - mean) * lax.rsqrt(var + ln_eps)).astype(cdt)

        rows = pl.ds(hr * Wr, Wr)
        k_ref[0, rows, :] = (jnp.dot(xn, wk_ref[...],
                                     preferred_element_type=jnp.float32)
                             + bk_ref[...]).astype(k_ref.dtype)
        v_ref[0, rows, :] = (jnp.dot(xn, wv_ref[...],
                                     preferred_element_type=jnp.float32)
                             + bv_ref[...]).astype(v_ref.dtype)


def _sra_kernel_sr(x_ref, k_ref, v_ref, wq_ref, wproj_ref, bproj_ref, o_ref,
                   *, num_heads):
    """sr_ratio > 1 attention path. grid = (B, N // TQ), both axes parallel.

    x_ref: (1, TQ, C) query-token tile; k_ref/v_ref: (1, Nr, C) precomputed.
    """
    cdt = x_ref.dtype
    x = x_ref[0]                                                       # (TQ, C)
    q = jnp.dot(x, wq_ref[...],
                preferred_element_type=jnp.float32).astype(cdt)
    out = _attend_accumulate(q, k_ref[0], v_ref[0], wproj_ref,
                             num_heads=num_heads)
    o_ref[0] = (out + bproj_ref[...]).astype(o_ref.dtype)


def _sra_kernel_nosr(x_ref, wq_ref, wk_ref, wv_ref, wproj_ref, bproj_ref,
                     o_ref, *, num_heads):
    """sr_ratio == 1 path (ordinary attention), BB batch elements per step."""
    cdt = x_ref.dtype
    BB = x_ref.shape[0]
    # TODO(synk): when N % 8 == 0 the BB batches could be flattened into one
    # (BB*N, C) operand to grow the MXU M dimension further.
    for i in range(BB):                        # static unroll, BB <= 8
        x = x_ref[i]                                                   # (N, C)
        q = jnp.dot(x, wq_ref[...],
                    preferred_element_type=jnp.float32).astype(cdt)
        k = jnp.dot(x, wk_ref[...],
                    preferred_element_type=jnp.float32).astype(cdt)
        v = jnp.dot(x, wv_ref[...],
                    preferred_element_type=jnp.float32).astype(cdt)
        out = _attend_accumulate(q, k, v, wproj_ref, num_heads=num_heads)
        o_ref[i] = (out + bproj_ref[...]).astype(o_ref.dtype)


# --------------------------------------------------------------------------
# Wrapper
# --------------------------------------------------------------------------
def spatial_reduction_attention(x, params, H, W, *, num_heads, sr_ratio,
                                ln_eps=1e-5, compute_dtype=None):
    B, N, C = x.shape
    assert N == H * W and C % num_heads == 0
    hd = C // num_heads
    scale = hd ** -0.5

    cdt = jnp.dtype(compute_dtype) if compute_dtype is not None else x.dtype
    isz = jnp.dtype(cdt).itemsize
    osz = jnp.dtype(x.dtype).itemsize

    # Weights as (in, out); fold the attention scale into wq (free).
    wq = (params["wq"].astype(jnp.float32) * scale).astype(cdt)
    wkv = params["wkv"].astype(jnp.float32)
    wk_f, wv_f = wkv[:, :C], wkv[:, C:]
    wproj = params["wproj"].astype(cdt)
    bproj = params["bproj"].astype(jnp.float32).reshape(1, C)

    x_c = x.astype(cdt)

    if sr_ratio > 1:
        # NOTE: the torch strided conv silently truncates non-divisible edges;
        # we require exact divisibility instead.
        assert H % sr_ratio == 0 and W % sr_ratio == 0
        sr = sr_ratio
        Hr, Wr = H // sr, W // sr
        Nr = Hr * Wr

        # Fold LayerNorm affine into the kv projection (free constant fold):
        #   (x_hat*gamma + beta) @ wk == x_hat @ (gamma[:,None]*wk) + beta @ wk
        gamma = params["ln_gamma"].astype(jnp.float32)
        beta = params["ln_beta"].astype(jnp.float32)
        wk = (gamma[:, None] * wk_f).astype(cdt)
        wv = (gamma[:, None] * wv_f).astype(cdt)
        bk = (beta @ wk_f).reshape(1, C)
        bv = (beta @ wv_f).reshape(1, C)

        # Strided conv weights grouped by ki: wsr[ki, kj*C + ci, co].
        wsr = jnp.transpose(params["w_conv"].astype(jnp.float32),
                            (2, 3, 1, 0)).reshape(sr, sr * C, C).astype(cdt)
        bsr = params["b_conv"].astype(jnp.float32).reshape(1, C)

        # Free (metadata-only) view of x for the producer: (B, Hr, sr, Wr, sr*C)
        x_view = x_c.reshape(B, Hr, sr, Wr, sr * C)

        # --------------------- 1) k/v producer call ----------------------
        kv_kernel = functools.partial(_kv_producer_kernel, sr=sr, ln_eps=ln_eps)
        kv_vmem = _vmem_limit(
            Hr * sr * _round_up(Wr, 8) * sr * C * isz,   # x block (padded)
            sr * sr * C * C * isz,                       # wsr
            2 * C * C * isz,                             # wk, wv
            2 * _round_up(Nr, 8) * C * isz,              # k, v output blocks
            4 * C * 4,                                   # biases
        )
        k_arr, v_arr = pl.pallas_call(
            kv_kernel,
            out_shape=(jax.ShapeDtypeStruct((B, Nr, C), cdt),
                       jax.ShapeDtypeStruct((B, Nr, C), cdt)),
            grid_spec=pltpu.PrefetchScalarGridSpec(
                num_scalar_prefetch=0,
                grid=(B,),
                in_specs=[
                    pl.BlockSpec((1, Hr, sr, Wr, sr * C),
                                 lambda b: (b, 0, 0, 0, 0)),            # x view
                    pl.BlockSpec((sr, sr * C, C), lambda b: (0, 0, 0)),  # wsr
                    pl.BlockSpec((1, C), lambda b: (0, 0)),              # bsr
                    pl.BlockSpec((C, C), lambda b: (0, 0)),              # wk
                    pl.BlockSpec((1, C), lambda b: (0, 0)),              # bk
                    pl.BlockSpec((C, C), lambda b: (0, 0)),              # wv
                    pl.BlockSpec((1, C), lambda b: (0, 0)),              # bv
                ],
                out_specs=(pl.BlockSpec((1, Nr, C), lambda b: (b, 0, 0)),
                           pl.BlockSpec((1, Nr, C), lambda b: (b, 0, 0))),
            ),
            compiler_params=pltpu.CompilerParams(
                dimension_semantics=("parallel",),
                vmem_limit_bytes=kv_vmem),
        )(x_view, wsr, bsr, wk, bk, wv, bv)

        # ----------------------- 2) attention call -----------------------
        TQ = _pick_query_tile(N)
        NT = N // TQ

        kernel = functools.partial(_sra_kernel_sr, num_heads=num_heads)
        attn_vmem = _vmem_limit(
            TQ * C * isz,                      # x tile
            TQ * C * osz,                      # out tile
            2 * _round_up(Nr, 8) * C * isz,    # k, v
            2 * C * C * isz,                   # wq, wproj
            C * 4,                             # bproj
        )
        # TODO(synk): constant-index-map weight / k / v streams could use
        # pipeline_mode=pl.Buffered(1) to free VMEM on v7x.
        return pl.pallas_call(
            kernel,
            out_shape=jax.ShapeDtypeStruct((B, N, C), x.dtype),
            grid_spec=pltpu.PrefetchScalarGridSpec(
                num_scalar_prefetch=0,
                grid=(B, NT),
                in_specs=[
                    pl.BlockSpec((1, TQ, C), lambda b, t: (b, t, 0)),   # x tile
                    pl.BlockSpec((1, Nr, C), lambda b, t: (b, 0, 0)),   # k
                    pl.BlockSpec((1, Nr, C), lambda b, t: (b, 0, 0)),   # v
                    pl.BlockSpec((C, C), lambda b, t: (0, 0)),          # wq
                    pl.BlockSpec((C, C), lambda b, t: (0, 0)),          # wproj
                    pl.BlockSpec((1, C), lambda b, t: (0, 0)),          # bproj
                ],
                out_specs=pl.BlockSpec((1, TQ, C), lambda b, t: (b, t, 0)),
            ),
            compiler_params=pltpu.CompilerParams(
                dimension_semantics=("parallel", "parallel"),
                vmem_limit_bytes=attn_vmem),
        )(x_c, k_arr, v_arr, wq, wproj, bproj)

    # --------------------------- sr_ratio == 1 ---------------------------
    wk = wk_f.astype(cdt)
    wv = wv_f.astype(cdt)
    BB = _pick_batch_block(B)

    kernel = functools.partial(_sra_kernel_nosr, num_heads=num_heads)
    vmem_limit = _vmem_limit(BB * N * C * isz, BB * N * C * osz,
                             4 * C * C * isz, C * 4)
    # TODO(synk): for C < 128 stages a lane-dense output view could avoid
    # masked partial stores (v5e); left as-is since C >= 128 for most stages.
    return pl.pallas_call(
        kernel,
        out_shape=jax.ShapeDtypeStruct((B, N, C), x.dtype),
        grid_spec=pltpu.PrefetchScalarGridSpec(
            num_scalar_prefetch=0,
            grid=(B // BB,),
            in_specs=[
                pl.BlockSpec((BB, N, C), lambda b: (b, 0, 0)),          # x
                pl.BlockSpec((C, C), lambda b: (0, 0)),                 # wq
                pl.BlockSpec((C, C), lambda b: (0, 0)),                 # wk
                pl.BlockSpec((C, C), lambda b: (0, 0)),                 # wv
                pl.BlockSpec((C, C), lambda b: (0, 0)),                 # wproj
                pl.BlockSpec((1, C), lambda b: (0, 0)),                 # bproj
            ],
            out_specs=pl.BlockSpec((BB, N, C), lambda b: (b, 0, 0)),
        ),
        compiler_params=pltpu.CompilerParams(
            dimension_semantics=("parallel",),
            vmem_limit_bytes=vmem_limit),
    )(x_c, wq, wk, wv, wproj, bproj)


# ---------------------------- pure-JAX reference ----------------------------
def reference_sra(x, params, H, W, *, num_heads, sr_ratio, ln_eps=1e-5):
    B, N, C = x.shape
    hd = C // num_heads
    scale = hd ** -0.5
    q = (x @ params["wq"]).reshape(B, N, num_heads, hd).transpose(0, 2, 1, 3)
    if sr_ratio > 1:
        x_img = jnp.transpose(x, (0, 2, 1)).reshape(B, C, H, W)       # NCHW
        y = jax.lax.conv_general_dilated(
            x_img, params["w_conv"], window_strides=(sr_ratio, sr_ratio),
            padding="VALID", dimension_numbers=("NCHW", "OIHW", "NCHW"))
        y = y + params["b_conv"][None, :, None, None]
        x_ = y.reshape(B, C, -1).transpose(0, 2, 1)                   # (B, Nr, C)
        mean = x_.mean(-1, keepdims=True)
        var = ((x_ - mean) ** 2).mean(-1, keepdims=True)
        x_ = (x_ - mean) / jnp.sqrt(var + ln_eps)
        x_ = x_ * params["ln_gamma"] + params["ln_beta"]
    else:
        x_ = x
    Nr = x_.shape[1]
    kv = (x_ @ params["wkv"]).reshape(B, Nr, 2, num_heads, hd).transpose(2, 0, 3, 1, 4)
    k, v = kv[0], kv[1]
    attn = jax.nn.softmax(jnp.einsum("bhqd,bhkd->bhqk", q, k) * scale, axis=-1)
    out = jnp.einsum("bhqk,bhkd->bhqd", attn, v).transpose(0, 2, 1, 3).reshape(B, N, C)
    return out @ params["wproj"] + params["bproj"][None, None, :]


def make_params(key, dim, sr_ratio):
    ks = jax.random.split(key, 8)
    rnd = lambda k, shape, s=0.05: jax.random.normal(k, shape, jnp.float32) * s
    p = {
        "wq": rnd(ks[0], (dim, dim)),           # (in, out) == torch q.weight.T
        "wkv": rnd(ks[1], (dim, 2 * dim)),      # (in, 2*out)
        "wproj": rnd(ks[2], (dim, dim)),
        "bproj": rnd(ks[3], (dim,)),
    }
    if sr_ratio > 1:
        p["w_conv"] = rnd(ks[4], (dim, dim, sr_ratio, sr_ratio))      # OIHW
        p["b_conv"] = rnd(ks[5], (dim,))
        p["ln_gamma"] = jnp.ones((dim,), jnp.float32) + rnd(ks[6], (dim,), 0.02)
        p["ln_beta"] = rnd(ks[7], (dim,), 0.02)
    return p


if __name__ == "__main__":
    B, H, W, C = 2, 8, 8, 64
    num_heads = 8
    N = H * W

    key = jax.random.PRNGKey(0)
    kx, kp1, kp2 = jax.random.split(key, 3)
    x = jax.random.normal(kx, (B, N, C), jnp.float32)

    ok = True
    for sr_ratio, pk in ((2, kp1), (1, kp2)):
        params = make_params(pk, C, sr_ratio)
        ref = reference_sra(x, params, H, W, num_heads=num_heads,
                            sr_ratio=sr_ratio)

        # f32 path (compute dtype follows input dtype)
        out = spatial_reduction_attention(x, params, H, W,
                                          num_heads=num_heads,
                                          sr_ratio=sr_ratio)
        out = jax.block_until_ready(out)
        if not jnp.allclose(out, ref, atol=5e-3, rtol=5e-3):
            ok = False
            print(f"f32 mismatch at sr_ratio={sr_ratio}: "
                  f"max abs err {float(jnp.max(jnp.abs(out - ref)))}")

        # bf16 MXU path (bf16 operands, f32 accumulation)
        out_bf = spatial_reduction_attention(x.astype(jnp.bfloat16), params,
                                             H, W, num_heads=num_heads,
                                             sr_ratio=sr_ratio)
        out_bf = jax.block_until_ready(out_bf).astype(jnp.float32)
        if not jnp.allclose(out_bf, ref, atol=6e-2, rtol=6e-2):
            ok = False
            print(f"bf16 mismatch at sr_ratio={sr_ratio}: "
                  f"max abs err {float(jnp.max(jnp.abs(out_bf - ref)))}")

    if ok:
        print("KERNEL_OK")
</pallas_src>

<mosaic_0001>
module attributes {stable_mosaic.version = 11 : i64} {
  func.func @_kv_producer_kernel(%arg0: i32, %arg1: memref<1x4x2x4x128xf32, #tpu.memory_space<vmem>>, %arg2: memref<2x128x64xf32, #tpu.memory_space<vmem>>, %arg3: memref<1x64xf32, #tpu.memory_space<vmem>>, %arg4: memref<64x64xf32, #tpu.memory_space<vmem>>, %arg5: memref<1x64xf32, #tpu.memory_space<vmem>>, %arg6: memref<64x64xf32, #tpu.memory_space<vmem>>, %arg7: memref<1x64xf32, #tpu.memory_space<vmem>>, %arg8: memref<1x16x64xf32, #tpu.memory_space<vmem>>, %arg9: memref<1x16x64xf32, #tpu.memory_space<vmem>>) attributes {dimension_semantics = [#tpu.dimension_semantics<parallel>], iteration_bounds = array<i64: 2>, scalar_prefetch = 0 : i64, scratch_operands = 0 : i64, tpu.core_type = #tpu.core_type<tc>, window_params = [{transform_indices = @transform_0, window_bounds = array<i64: 1, 4, 2, 4, 128>}, {pipeline_mode = #tpu.pipeline_mode<synchronous>, transform_indices = @transform_1, window_bounds = array<i64: 2, 128, 64>}, {pipeline_mode = #tpu.pipeline_mode<synchronous>, transform_indices = @transform_2, window_bounds = array<i64: 1, 64>}, {pipeline_mode = #tpu.pipeline_mode<synchronous>, transform_indices = @transform_3, window_bounds = array<i64: 64, 64>}, {pipeline_mode = #tpu.pipeline_mode<synchronous>, transform_indices = @transform_4, window_bounds = array<i64: 1, 64>}, {pipeline_mode = #tpu.pipeline_mode<synchronous>, transform_indices = @transform_5, window_bounds = array<i64: 64, 64>}, {pipeline_mode = #tpu.pipeline_mode<synchronous>, transform_indices = @transform_6, window_bounds = array<i64: 1, 64>}, {transform_indices = @transform_7, window_bounds = array<i64: 1, 16, 64>}, {transform_indices = @transform_8, window_bounds = array<i64: 1, 16, 64>}]} {
    %cst = arith.constant 0.000000e+00 : f32
    %0 = vector.broadcast %cst : f32 to vector<4x64xf32>
    %c0 = arith.constant 0 : index
    %c0_0 = arith.constant 0 : index
    %c0_1 = arith.constant 0 : index
    %c0_2 = arith.constant 0 : index
    %c0_3 = arith.constant 0 : index
    %1 = vector.load %arg1[%c0, %c0_0, %c0_1, %c0_2, %c0_3] : memref<1x4x2x4x128xf32, #tpu.memory_space<vmem>>, vector<1x1x1x4x128xf32>
    %2 = vector.shape_cast %1 : vector<1x1x1x4x128xf32> to vector<4x128xf32>
    %c0_4 = arith.constant 0 : index
    %c0_5 = arith.constant 0 : index
    %c0_6 = arith.constant 0 : index
    %3 = vector.load %arg2[%c0_4, %c0_5, %c0_6] : memref<2x128x64xf32, #tpu.memory_space<vmem>>, vector<1x128x64xf32>
    %4 = vector.shape_cast %3 : vector<1x128x64xf32> to vector<128x64xf32>
    %cst_7 = arith.constant dense<0.000000e+00> : vector<4x64xf32>
    %5 = tpu.matmul %2, %4, %cst_7 {dimension_numbers = #tpu.dot_dimension_numbers<[1], [0], [0], [1], [0, 0, 1, 1], [], []>} : vector<4x128xf32>, vector<128x64xf32>, vector<4x64xf32> -> vector<4x64xf32>
    %6 = arith.addf %0, %5 : vector<4x64xf32>
    %c0_8 = arith.constant 0 : index
    %c0_9 = arith.constant 0 : index
    %c1 = arith.constant 1 : index
    %c0_10 = arith.constant 0 : index
    %c0_11 = arith.constant 0 : index
    %7 = vector.load %arg1[%c0_8, %c0_9, %c1, %c0_10, %c0_11] : memref<1x4x2x4x128xf32, #tpu.memory_space<vmem>>, vector<1x1x1x4x128xf32>
    %8 = vector.shape_cast %7 : vector<1x1x1x4x128xf32> to vector<4x128xf32>
    %c1_12 = arith.constant 1 : index
    %c0_13 = arith.constant 0 : index
    %c0_14 = arith.constant 0 : index
    %9 = vector.load %arg2[%c1_12, %c0_13, %c0_14] : memref<2x128x64xf32, #tpu.memory_space<vmem>>, vector<1x128x64xf32>
    %10 = vector.shape_cast %9 : vector<1x128x64xf32> to vector<128x64xf32>
    %cst_15 = arith.constant dense<0.000000e+00> : vector<4x64xf32>
    %11 = tpu.matmul %8, %10, %cst_15 {dimension_numbers = #tpu.dot_dimension_numbers<[1], [0], [0], [1], [0, 0, 1, 1], [], []>} : vector<4x128xf32>, vector<128x64xf32>, vector<4x64xf32> -> vector<4x64xf32>
    %12 = arith.addf %6, %11 : vector<4x64xf32>
    %c0_16 = arith.constant 0 : index
    %c0_17 = arith.constant 0 : index
    %13 = vector.load %arg3[%c0_16, %c0_17] : memref<1x64xf32, #tpu.memory_space<vmem>>, vector<1x64xf32>
    %14 = vector.broadcast %13 : vector<1x64xf32> to vector<4x64xf32>
    %15 = arith.addf %12, %14 : vector<4x64xf32>
    %cst_18 = arith.constant dense<0.000000e+00> : vector<4xf32>
    %16 = vector.multi_reduction <add>, %15, %cst_18 [1] : vector<4x64xf32> to vector<4xf32>
    %17 = vector.shape_cast %16 : vector<4xf32> to vector<4x1xf32>
    %cst_19 = arith.constant 6.400000e+01 : f32
    %18 = vector.broadcast %cst_19 : f32 to vector<4x1xf32>
    %19 = arith.divf %17, %18 : vector<4x1xf32>
    %20 = vector.broadcast %19 : vector<4x1xf32> to vector<4x64xf32>
    %21 = arith.subf %15, %20 : vector<4x64xf32>
    %22 = arith.mulf %21, %21 : vector<4x64xf32>
    %cst_20 = arith.constant dense<0.000000e+00> : vector<4xf32>
    %23 = vector.multi_reduction <add>, %22, %cst_20 [1] : vector<4x64xf32> to vector<4xf32>
    %24 = vector.shape_cast %23 : vector<4xf32> to vector<4x1xf32>
    %cst_21 = arith.constant 6.400000e+01 : f32
    %25 = vector.broadcast %cst_21 : f32 to vector<4x1xf32>
    %26 = arith.divf %24, %25 : vector<4x1xf32>
    %27 = vector.broadcast %19 : vector<4x1xf32> to vector<4x64xf32>
    %28 = arith.subf %15, %27 : vector<4x64xf32>
    %cst_22 = arith.constant 9.99999974E-6 : f32
    %29 = vector.broadcast %cst_22 : f32 to vector<4x1xf32>
    %30 = arith.addf %26, %29 : vector<4x1xf32>
    %31 = math.rsqrt %30 : vector<4x1xf32>
    %32 = vector.broadcast %31 : vector<4x1xf32> to vector<4x64xf32>
    %33 = arith.mulf %28, %32 : vector<4x64xf32>
    %c0_23 = arith.constant 0 : index
    %c0_24 = arith.constant 0 : index
    %34 = vector.load %arg4[%c0_23, %c0_24] : memref<64x64xf32, #tpu.memory_space<vmem>>, vector<64x64xf32>
    %cst_25 = arith.constant dense<0.000000e+00> : vector<4x64xf32>
    %35 = tpu.matmul %33, %34, %cst_25 {dimension_numbers = #tpu.dot_dimension_numbers<[1], [0], [0], [1], [0, 0, 1, 1], [], []>} : vector<4x64xf32>, vector<64x64xf32>, vector<4x64xf32> -> vector<4x64xf32>
    %c0_26 = arith.constant 0 : index
    %c0_27 = arith.constant 0 : index
    %36 = vector.load %arg5[%c0_26, %c0_27] : memref<1x64xf32, #tpu.memory_space<vmem>>, vector<1x64xf32>
    %37 = vector.broadcast %36 : vector<1x64xf32> to vector<4x64xf32>
    %38 = arith.addf %35, %37 : vector<4x64xf32>
    %c0_28 = arith.constant 0 : index
    %c0_29 = arith.constant 0 : index
    %c0_30 = arith.constant 0 : index
    %39 = vector.load %arg8[%c0_28, %c0_29, %c0_30] : memref<1x16x64xf32, #tpu.memory_space<vmem>>, vector<1x4x64xf32>
    %40 = vector.shape_cast %39 : vector<1x4x64xf32> to vector<4x64xf32>
    %41 = vector.shape_cast %38 : vector<4x64xf32> to vector<1x4x64xf32>
    tpu.vector_store %arg8[%c0_28, %c0_29, %c0_30], %41 {strides = array<i32>} : memref<1x16x64xf32, #tpu.memory_space<vmem>>, vector<1x4x64xf32>,
    %c0_31 = arith.constant 0 : index
    %c0_32 = arith.constant 0 : index
    %42 = vector.load %arg6[%c0_31, %c0_32] : memref<64x64xf32, #tpu.memory_space<vmem>>, vector<64x64xf32>
    %cst_33 = arith.constant dense<0.000000e+00> : vector<4x64xf32>
    %43 = tpu.matmul %33, %42, %cst_33 {dimension_numbers = #tpu.dot_dimension_numbers<[1], [0], [0], [1], [0, 0, 1, 1], [], []>} : vector<4x64xf32>, vector<64x64xf32>, vector<4x64xf32> -> vector<4x64xf32>
    %c0_34 = arith.constant 0 : index
    %c0_35 = arith.constant 0 : index
    %44 = vector.load %arg7[%c0_34, %c0_35] : memref<1x64xf32, #tpu.memory_space<vmem>>, vector<1x64xf32>
    %45 = vector.broadcast %44 : vector<1x64xf32> to vector<4x64xf32>
    %46 = arith.addf %43, %45 : vector<4x64xf32>
    %c0_36 = arith.constant 0 : index
    %c0_37 = arith.constant 0 : index
    %c0_38 = arith.constant 0 : index
    %47 = vector.load %arg9[%c0_36, %c0_37, %c0_38] : memref<1x16x64xf32, #tpu.memory_space<vmem>>, vector<1x4x64xf32>
    %48 = vector.shape_cast %47 : vector<1x4x64xf32> to vector<4x64xf32>
    %49 = vector.shape_cast %46 : vector<4x64xf32> to vector<1x4x64xf32>
    tpu.vector_store %arg9[%c0_36, %c0_37, %c0_38], %49 {strides = array<i32>} : memref<1x16x64xf32, #tpu.memory_space<vmem>>, vector<1x4x64xf32>,
    %cst_39 = arith.constant 0.000000e+00 : f32
    %50 = vector.broadcast %cst_39 : f32 to vector<4x64xf32>
    %c0_40 = arith.constant 0 : index
    %c1_41 = arith.constant 1 : index
    %c0_42 = arith.constant 0 : index
    %c0_43 = arith.constant 0 : index
    %c0_44 = arith.constant 0 : index
    %51 = vector.load %arg1[%c0_40, %c1_41, %c0_42, %c0_43, %c0_44] : memref<1x4x2x4x128xf32, #tpu.memory_space<vmem>>, vector<1x1x1x4x128xf32>
    %52 = vector.shape_cast %51 : vector<1x1x1x4x128xf32> to vector<4x128xf32>
    %c0_45 = arith.constant 0 : index
    %c0_46 = arith.constant 0 : index
    %c0_47 = arith.constant 0 : index
    %53 = vector.load %arg2[%c0_45, %c0_46, %c0_47] : memref<2x128x64xf32, #tpu.memory_space<vmem>>, vector<1x128x64xf32>
    %54 = vector.shape_cast %53 : vector<1x128x64xf32> to vector<128x64xf32>
    %cst_48 = arith.constant dense<0.000000e+00> : vector<4x64xf32>
    %55 = tpu.matmul %52, %54, %cst_48 {dimension_numbers = #tpu.dot_dimension_numbers<[1], [0], [0], [1], [0, 0, 1, 1], [], []>} : vector<4x128xf32>, vector<128x64xf32>, vector<4x64xf32> -> vector<4x64xf32>
    %56 = arith.addf %50, %55 : vector<4x64xf32>
    %c0_49 = arith.constant 0 : index
    %c1_50 = arith.constant 1 : index
    %c1_51 = arith.constant 1 : index
    %c0_52 = arith.constant 0 : index
    %c0_53 = arith.constant 0 : index
    %57 = vector.load %arg1[%c0_49, %c1_50, %c1_51, %c0_52, %c0_53] : memref<1x4x2x4x128xf32, #tpu.memory_space<vmem>>, vector<1x1x1x4x128xf32>
    %58 = vector.shape_cast %57 : vector<1x1x1x4x128xf32> to vector<4x128xf32>
    %c1_54 = arith.constant 1 : index
    %c0_55 = arith.constant 0 : index
    %c0_56 = arith.constant 0 : index
    %59 = vector.load %arg2[%c1_54, %c0_55, %c0_56] : memref<2x128x64xf32, #tpu.memory_space<vmem>>, vector<1x128x64xf32>
    %60 = vector.shape_cast %59 : vector<1x128x64xf32> to vector<128x64xf32>
    %cst_57 = arith.constant dense<0.000000e+00> : vector<4x64xf32>
    %61 = tpu.matmul %58, %60, %cst_57 {dimension_numbers = #tpu.dot_dimension_numbers<[1], [0], [0], [1], [0, 0, 1, 1], [], []>} : vector<4x128xf32>, vector<128x64xf32>, vector<4x64xf32> -> vector<4x64xf32>
    %62 = arith.addf %56, %61 : vector<4x64xf32>
    %c0_58 = arith.constant 0 : index
    %c0_59 = arith.constant 0 : index
    %63 = vector.load %arg3[%c0_58, %c0_59] : memref<1x64xf32, #tpu.memory_space<vmem>>, vector<1x64xf32>
    %64 = vector.broadcast %63 : vector<1x64xf32> to vector<4x64xf32>
    %65 = arith.addf %62, %64 : vector<4x64xf32>
    %cst_60 = arith.constant dense<0.000000e+00> : vector<4xf32>
    %66 = vector.multi_reduction <add>, %65, %cst_60 [1] : vector<4x64xf32> to vector<4xf32>
    %67 = vector.shape_cast %66 : vector<4xf32> to vector<4x1xf32>
    %cst_61 = arith.constant 6.400000e+01 : f32
    %68 = vector.broadcast %cst_61 : f32 to vector<4x1xf32>
    %69 = arith.divf %67, %68 : vector<4x1xf32>
    %70 = vector.broadcast %69 : vector<4x1xf32> to vector<4x64xf32>
    %71 = arith.subf %65, %70 : vector<4x64xf32>
    %72 = arith.mulf %71, %71 : vector<4x64xf32>
    %cst_62 = arith.constant dense<0.000000e+00> : vector<4xf32>
    %73 = vector.multi_reduction <add>, %72, %cst_62 [1] : vector<4x64xf32> to vector<4xf32>
    %74 = vector.shape_cast %73 : vector<4xf32> to vector<4x1xf32>
    %cst_63 = arith.constant 6.400000e+01 : f32
    %75 = vector.broadcast %cst_63 : f32 to vector<4x1xf32>
    %76 = arith.divf %74, %75 : vector<4x1xf32>
    %77 = vector.broadcast %69 : vector<4x1xf32> to vector<4x64xf32>
    %78 = arith.subf %65, %77 : vector<4x64xf32>
    %cst_64 = arith.constant 9.99999974E-6 : f32
    %79 = vector.broadcast %cst_64 : f32 to vector<4x1xf32>
    %80 = arith.addf %76, %79 : vector<4x1xf32>
    %81 = math.rsqrt %80 : vector<4x1xf32>
    %82 = vector.broadcast %81 : vector<4x1xf32> to vector<4x64xf32>
    %83 = arith.mulf %78, %82 : vector<4x64xf32>
    %c0_65 = arith.constant 0 : index
    %c0_66 = arith.constant 0 : index
    %84 = vector.load %arg4[%c0_65, %c0_66] : memref<64x64xf32, #tpu.memory_space<vmem>>, vector<64x64xf32>
    %cst_67 = arith.constant dense<0.000000e+00> : vector<4x64xf32>
    %85 = tpu.matmul %83, %84, %cst_67 {dimension_numbers = #tpu.dot_dimension_numbers<[1], [0], [0], [1], [0, 0, 1, 1], [], []>} : vector<4x64xf32>, vector<64x64xf32>, vector<4x64xf32> -> vector<4x64xf32>
    %c0_68 = arith.constant 0 : index
    %c0_69 = arith.constant 0 : index
    %86 = vector.load %arg5[%c0_68, %c0_69] : memref<1x64xf32, #tpu.memory_space<vmem>>, vector<1x64xf32>
    %87 = vector.broadcast %86 : vector<1x64xf32> to vector<4x64xf32>
    %88 = arith.addf %85, %87 : vector<4x64xf32>
    %c0_70 = arith.constant 0 : index
    %c4 = arith.constant 4 : index
    %c0_71 = arith.constant 0 : index
    %89 = vector.load %arg8[%c0_70, %c4, %c0_71] : memref<1x16x64xf32, #tpu.memory_space<vmem>>, vector<1x4x64xf32>
    %90 = vector.shape_cast %89 : vector<1x4x64xf32> to vector<4x64xf32>
    %91 = vector.shape_cast %88 : vector<4x64xf32> to vector<1x4x64xf32>
    tpu.vector_store %arg8[%c0_70, %c4, %c0_71], %91 {strides = array<i32>} : memref<1x16x64xf32, #tpu.memory_space<vmem>>, vector<1x4x64xf32>,
    %c0_72 = arith.constant 0 : index
    %c0_73 = arith.constant 0 : index
    %92 = vector.load %arg6[%c0_72, %c0_73] : memref<64x64xf32, #tpu.memory_space<vmem>>, vector<64x64xf32>
    %cst_74 = arith.constant dense<0.000000e+00> : vector<4x64xf32>
    %93 = tpu.matmul %83, %92, %cst_74 {dimension_numbers = #tpu.dot_dimension_numbers<[1], [0], [0], [1], [0, 0, 1, 1], [], []>} : vector<4x64xf32>, vector<64x64xf32>, vector<4x64xf32> -> vector<4x64xf32>
    %c0_75 = arith.constant 0 : index
    %c0_76 = arith.constant 0 : index
    %94 = vector.load %arg7[%c0_75, %c0_76] : memref<1x64xf32, #tpu.memory_space<vmem>>, vector<1x64xf32>
    %95 = vector.broadcast %94 : vector<1x64xf32> to vector<4x64xf32>
    %96 = arith.addf %93, %95 : vector<4x64xf32>
    %c0_77 = arith.constant 0 : index
    %c4_78 = arith.constant 4 : index
    %c0_79 = arith.constant 0 : index
    %97 = vector.load %arg9[%c0_77, %c4_78, %c0_79] : memref<1x16x64xf32, #tpu.memory_space<vmem>>, vector<1x4x64xf32>
    %98 = vector.shape_cast %97 : vector<1x4x64xf32> to vector<4x64xf32>
    %99 = vector.shape_cast %96 : vector<4x64xf32> to vector<1x4x64xf32>
    tpu.vector_store %arg9[%c0_77, %c4_78, %c0_79], %99 {strides = array<i32>} : memref<1x16x64xf32, #tpu.memory_space<vmem>>, vector<1x4x64xf32>,
    %cst_80 = arith.constant 0.000000e+00 : f32
    %100 = vector.broadcast %cst_80 : f32 to vector<4x64xf32>
    %c0_81 = arith.constant 0 : index
    %c2 = arith.constant 2 : index
    %c0_82 = arith.constant 0 : index
    %c0_83 = arith.constant 0 : index
    %c0_84 = arith.constant 0 : index
    %101 = vector.load %arg1[%c0_81, %c2, %c0_82, %c0_83, %c0_84] : memref<1x4x2x4x128xf32, #tpu.memory_space<vmem>>, vector<1x1x1x4x128xf32>
    %102 = vector.shape_cast %101 : vector<1x1x1x4x128xf32> to vector<4x128xf32>
    %c0_85 = arith.constant 0 : index
    %c0_86 = arith.constant 0 : index
    %c0_87 = arith.constant 0 : index
    %103 = vector.load %arg2[%c0_85, %c0_86, %c0_87] : memref<2x128x64xf32, #tpu.memory_space<vmem>>, vector<1x128x64xf32>
    %104 = vector.shape_cast %103 : vector<1x128x64xf32> to vector<128x64xf32>
    %cst_88 = arith.constant dense<0.000000e+00> : vector<4x64xf32>
    %105 = tpu.matmul %102, %104, %cst_88 {dimension_numbers = #tpu.dot_dimension_numbers<[1], [0], [0], [1], [0, 0, 1, 1], [], []>} : vector<4x128xf32>, vector<128x64xf32>, vector<4x64xf32> -> vector<4x64xf32>
    %106 = arith.addf %100, %105 : vector<4x64xf32>
    %c0_89 = arith.constant 0 : index
    %c2_90 = arith.constant 2 : index
    %c1_91 = arith.constant 1 : index
    %c0_92 = arith.constant 0 : index
    %c0_93 = arith.constant 0 : index
    %107 = vector.load %arg1[%c0_89, %c2_90, %c1_91, %c0_92, %c0_93] : memref<1x4x2x4x128xf32, #tpu.memory_space<vmem>>, vector<1x1x1x4x128xf32>
    %108 = vector.shape_cast %107 : vector<1x1x1x4x128xf32> to vector<4x128xf32>
    %c1_94 = arith.constant 1 : index
    %c0_95 = arith.constant 0 : index
    %c0_96 = arith.constant 0 : index
    %109 = vector.load %arg2[%c1_94, %c0_95, %c0_96] : memref<2x128x64xf32, #tpu.memory_space<vmem>>, vector<1x128x64xf32>
    %110 = vector.shape_cast %109 : vector<1x128x64xf32> to vector<128x64xf32>
    %cst_97 = arith.constant dense<0.000000e+00> : vector<4x64xf32>
    %111 = tpu.matmul %108, %110, %cst_97 {dimension_numbers = #tpu.dot_dimension_numbers<[1], [0], [0], [1], [0, 0, 1, 1], [], []>} : vector<4x128xf32>, vector<128x64xf32>, vector<4x64xf32> -> vector<4x64xf32>
    %112 = arith.addf %106, %111 : vector<4x64xf32>
    %c0_98 = arith.constant 0 : index
    %c0_99 = arith.constant 0 : index
    %113 = vector.load %arg3[%c0_98, %c0_99] : memref<1x64xf32, #tpu.memory_space<vmem>>, vector<1x64xf32>
    %114 = vector.broadcast %113 : vector<1x64xf32> to vector<4x64xf32>
    %115 = arith.addf %112, %114 : vector<4x64xf32>
    %cst_100 = arith.constant dense<0.000000e+00> : vector<4xf32>
    %116 = vector.multi_reduction <add>, %115, %cst_100 [1] : vector<4x64xf32> to vector<4xf32>
    %117 = vector.shape_cast %116 : vector<4xf32> to vector<4x1xf32>
    %cst_101 = arith.constant 6.400000e+01 : f32
    %118 = vector.broadcast %cst_101 : f32 to vector<4x1xf32>
    %119 = arith.divf %117, %118 : vector<4x1xf32>
    %120 = vector.broadcast %119 : vector<4x1xf32> to vector<4x64xf32>
    %121 = arith.subf %115, %120 : vector<4x64xf32>
    %122 = arith.mulf %121, %121 : vector<4x64xf32>
    %cst_102 = arith.constant dense<0.000000e+00> : vector<4xf32>
    %123 = vector.multi_reduction <add>, %122, %cst_102 [1] : vector<4x64xf32> to vector<4xf32>
    %124 = vector.shape_cast %123 : vector<4xf32> to vector<4x1xf32>
    %cst_103 = arith.constant 6.400000e+01 : f32
    %125 = vector.broadcast %cst_103 : f32 to vector<4x1xf32>
    %126 = arith.divf %124, %125 : vector<4x1xf32>
    %127 = vector.broadcast %119 : vector<4x1xf32> to vector<4x64xf32>
    %128 = arith.subf %115, %127 : vector<4x64xf32>
    %cst_104 = arith.constant 9.99999974E-6 : f32
    %129 = vector.broadcast %cst_104 : f32 to vector<4x1xf32>
    %130 = arith.addf %126, %129 : vector<4x1xf32>
    %131 = math.rsqrt %130 : vector<4x1xf32>
    %132 = vector.broadcast %131 : vector<4x1xf32> to vector<4x64xf32>
    %133 = arith.mulf %128, %132 : vector<4x64xf32>
    %c0_105 = arith.constant 0 : index
    %c0_106 = arith.constant 0 : index
    %134 = vector.load %arg4[%c0_105, %c0_106] : memref<64x64xf32, #tpu.memory_space<vmem>>, vector<64x64xf32>
    %cst_107 = arith.constant dense<0.000000e+00> : vector<4x64xf32>
    %135 = tpu.matmul %133, %134, %cst_107 {dimension_numbers = #tpu.dot_dimension_numbers<[1], [0], [0], [1], [0, 0, 1, 1], [], []>} : vector<4x64xf32>, vector<64x64xf32>, vector<4x64xf32> -> vector<4x64xf32>
    %c0_108 = arith.constant 0 : index
    %c0_109 = arith.constant 0 : index
    %136 = vector.load %arg5[%c0_108, %c0_109] : memref<1x64xf32, #tpu.memory_space<vmem>>, vector<1x64xf32>
    %137 = vector.broadcast %136 : vector<1x64xf32> to vector<4x64xf32>
    %138 = arith.addf %135, %137 : vector<4x64xf32>
    %c0_110 = arith.constant 0 : index
    %c8 = arith.constant 8 : index
    %c0_111 = arith.constant 0 : index
    %139 = vector.load %arg8[%c0_110, %c8, %c0_111] : memref<1x16x64xf32, #tpu.memory_space<vmem>>, vector<1x4x64xf32>
    %140 = vector.shape_cast %139 : vector<1x4x64xf32> to vector<4x64xf32>
    %141 = vector.shape_cast %138 : vector<4x64xf32> to vector<1x4x64xf32>
    tpu.vector_store %arg8[%c0_110, %c8, %c0_111], %141 {strides = array<i32>} : memref<1x16x64xf32, #tpu.memory_space<vmem>>, vector<1x4x64xf32>,
    %c0_112 = arith.constant 0 : index
    %c0_113 = arith.constant 0 : index
    %142 = vector.load %arg6[%c0_112, %c0_113] : memref<64x64xf32, #tpu.memory_space<vmem>>, vector<64x64xf32>
    %cst_114 = arith.constant dense<0.000000e+00> : vector<4x64xf32>
    %143 = tpu.matmul %133, %142, %cst_114 {dimension_numbers = #tpu.dot_dimension_numbers<[1], [0], [0], [1], [0, 0, 1, 1], [], []>} : vector<4x64xf32>, vector<64x64xf32>, vector<4x64xf32> -> vector<4x64xf32>
    %c0_115 = arith.constant 0 : index
    %c0_116 = arith.constant 0 : index
    %144 = vector.load %arg7[%c0_115, %c0_116] : memref<1x64xf32, #tpu.memory_space<vmem>>, vector<1x64xf32>
    %145 = vector.broadcast %144 : vector<1x64xf32> to vector<4x64xf32>
    %146 = arith.addf %143, %145 : vector<4x64xf32>
    %c0_117 = arith.constant 0 : index
    %c8_118 = arith.constant 8 : index
    %c0_119 = arith.constant 0 : index
    %147 = vector.load %arg9[%c0_117, %c8_118, %c0_119] : memref<1x16x64xf32, #tpu.memory_space<vmem>>, vector<1x4x64xf32>
    %148 = vector.shape_cast %147 : vector<1x4x64xf32> to vector<4x64xf32>
    %149 = vector.shape_cast %146 : vector<4x64xf32> to vector<1x4x64xf32>
    tpu.vector_store %arg9[%c0_117, %c8_118, %c0_119], %149 {strides = array<i32>} : memref<1x16x64xf32, #tpu.memory_space<vmem>>, vector<1x4x64xf32>,
    %cst_120 = arith.constant 0.000000e+00 : f32
    %150 = vector.broadcast %cst_120 : f32 to vector<4x64xf32>
    %c0_121 = arith.constant 0 : index
    %c3 = arith.constant 3 : index
    %c0_122 = arith.constant 0 : index
    %c0_123 = arith.constant 0 : index
    %c0_124 = arith.constant 0 : index
    %151 = vector.load %arg1[%c0_121, %c3, %c0_122, %c0_123, %c0_124] : memref<1x4x2x4x128xf32, #tpu.memory_space<vmem>>, vector<1x1x1x4x128xf32>
    %152 = vector.shape_cast %151 : vector<1x1x1x4x128xf32> to vector<4x128xf32>
    %c0_125 = arith.constant 0 : index
    %c0_126 = arith.constant 0 : index
    %c0_127 = arith.constant 0 : index
    %153 = vector.load %arg2[%c0_125, %c0_126, %c0_127] : memref<2x128x64xf32, #tpu.memory_space<vmem>>, vector<1x128x64xf32>
    %154 = vector.shape_cast %153 : vector<1x128x64xf32> to vector<128x64xf32>
    %cst_128 = arith.constant dense<0.000000e+00> : vector<4x64xf32>
    %155 = tpu.matmul %152, %154, %cst_128 {dimension_numbers = #tpu.dot_dimension_numbers<[1], [0], [0], [1], [0, 0, 1, 1], [], []>} : vector<4x128xf32>, vector<128x64xf32>, vector<4x64xf32> -> vector<4x64xf32>
    %156 = arith.addf %150, %155 : vector<4x64xf32>
    %c0_129 = arith.constant 0 : index
    %c3_130 = arith.constant 3 : index
    %c1_131 = arith.constant 1 : index
    %c0_132 = arith.constant 0 : index
    %c0_133 = arith.constant 0 : index
    %157 = vector.load %arg1[%c0_129, %c3_130, %c1_131, %c0_132, %c0_133] : memref<1x4x2x4x128xf32, #tpu.memory_space<vmem>>, vector<1x1x1x4x128xf32>
    %158 = vector.shape_cast %157 : vector<1x1x1x4x128xf32> to vector<4x128xf32>
    %c1_134 = arith.constant 1 : index
    %c0_135 = arith.constant 0 : index
    %c0_136 = arith.constant 0 : index
    %159 = vector.load %arg2[%c1_134, %c0_135, %c0_136] : memref<2x128x64xf32, #tpu.memory_space<vmem>>, vector<1x128x64xf32>
    %160 = vector.shape_cast %159 : vector<1x128x64xf32> to vector<128x64xf32>
    %cst_137 = arith.constant dense<0.000000e+00> : vector<4x64xf32>
    %161 = tpu.matmul %158, %160, %cst_137 {dimension_numbers = #tpu.dot_dimension_numbers<[1], [0], [0], [1], [0, 0, 1, 1], [], []>} : vector<4x128xf32>, vector<128x64xf32>, vector<4x64xf32> -> vector<4x64xf32>
    %162 = arith.addf %156, %161 : vector<4x64xf32>
    %c0_138 = arith.constant 0 : index
    %c0_139 = arith.constant 0 : index
    %163 = vector.load %arg3[%c0_138, %c0_139] : memref<1x64xf32, #tpu.memory_space<vmem>>, vector<1x64xf32>
    %164 = vector.broadcast %163 : vector<1x64xf32> to vector<4x64xf32>
    %165 = arith.addf %162, %164 : vector<4x64xf32>
    %cst_140 = arith.constant dense<0.000000e+00> : vector<4xf32>
    %166 = vector.multi_reduction <add>, %165, %cst_140 [1] : vector<4x64xf32> to vector<4xf32>
    %167 = vector.shape_cast %166 : vector<4xf32> to vector<4x1xf32>
    %cst_141 = arith.constant 6.400000e+01 : f32
    %168 = vector.broadcast %cst_141 : f32 to vector<4x1xf32>
    %169 = arith.divf %167, %168 : vector<4x1xf32>
    %170 = vector.broadcast %169 : vector<4x1xf32> to vector<4x64xf32>
    %171 = arith.subf %165, %170 : vector<4x64xf32>
    %172 = arith.mulf %171, %171 : vector<4x64xf32>
    %cst_142 = arith.constant dense<0.000000e+00> : vector<4xf32>
    %173 = vector.multi_reduction <add>, %172, %cst_142 [1] : vector<4x64xf32> to vector<4xf32>
    %174 = vector.shape_cast %173 : vector<4xf32> to vector<4x1xf32>
    %cst_143 = arith.constant 6.400000e+01 : f32
    %175 = vector.broadcast %cst_143 : f32 to vector<4x1xf32>
    %176 = arith.divf %174, %175 : vector<4x1xf32>
    %177 = vector.broadcast %169 : vector<4x1xf32> to vector<4x64xf32>
    %178 = arith.subf %165, %177 : vector<4x64xf32>
    %cst_144 = arith.constant 9.99999974E-6 : f32
    %179 = vector.broadcast %cst_144 : f32 to vector<4x1xf32>
    %180 = arith.addf %176, %179 : vector<4x1xf32>
    %181 = math.rsqrt %180 : vector<4x1xf32>
    %182 = vector.broadcast %181 : vector<4x1xf32> to vector<4x64xf32>
    %183 = arith.mulf %178, %182 : vector<4x64xf32>
    %c0_145 = arith.constant 0 : index
    %c0_146 = arith.constant 0 : index
    %184 = vector.load %arg4[%c0_145, %c0_146] : memref<64x64xf32, #tpu.memory_space<vmem>>, vector<64x64xf32>
    %cst_147 = arith.constant dense<0.000000e+00> : vector<4x64xf32>
    %185 = tpu.matmul %183, %184, %cst_147 {dimension_numbers = #tpu.dot_dimension_numbers<[1], [0], [0], [1], [0, 0, 1, 1], [], []>} : vector<4x64xf32>, vector<64x64xf32>, vector<4x64xf32> -> vector<4x64xf32>
    %c0_148 = arith.constant 0 : index
    %c0_149 = arith.constant 0 : index
    %186 = vector.load %arg5[%c0_148, %c0_149] : memref<1x64xf32, #tpu.memory_space<vmem>>, vector<1x64xf32>
    %187 = vector.broadcast %186 : vector<1x64xf32> to vector<4x64xf32>
    %188 = arith.addf %185, %187 : vector<4x64xf32>
    %c0_150 = arith.constant 0 : index
    %c12 = arith.constant 12 : index
    %c0_151 = arith.constant 0 : index
    %189 = vector.load %arg8[%c0_150, %c12, %c0_151] : memref<1x16x64xf32, #tpu.memory_space<vmem>>, vector<1x4x64xf32>
    %190 = vector.shape_cast %189 : vector<1x4x64xf32> to vector<4x64xf32>
    %191 = vector.shape_cast %188 : vector<4x64xf32> to vector<1x4x64xf32>
    tpu.vector_store %arg8[%c0_150, %c12, %c0_151], %191 {strides = array<i32>} : memref<1x16x64xf32, #tpu.memory_space<vmem>>, vector<1x4x64xf32>,
    %c0_152 = arith.constant 0 : index
    %c0_153 = arith.constant 0 : index
    %192 = vector.load %arg6[%c0_152, %c0_153] : memref<64x64xf32, #tpu.memory_space<vmem>>, vector<64x64xf32>
    %cst_154 = arith.constant dense<0.000000e+00> : vector<4x64xf32>
    %193 = tpu.matmul %183, %192, %cst_154 {dimension_numbers = #tpu.dot_dimension_numbers<[1], [0], [0], [1], [0, 0, 1, 1], [], []>} : vector<4x64xf32>, vector<64x64xf32>, vector<4x64xf32> -> vector<4x64xf32>
    %c0_155 = arith.constant 0 : index
    %c0_156 = arith.constant 0 : index
    %194 = vector.load %arg7[%c0_155, %c0_156] : memref<1x64xf32, #tpu.memory_space<vmem>>, vector<1x64xf32>
    %195 = vector.broadcast %194 : vector<1x64xf32> to vector<4x64xf32>
    %196 = arith.addf %193, %195 : vector<4x64xf32>
    %c0_157 = arith.constant 0 : index
    %c12_158 = arith.constant 12 : index
    %c0_159 = arith.constant 0 : index
    %197 = vector.load %arg9[%c0_157, %c12_158, %c0_159] : memref<1x16x64xf32, #tpu.memory_space<vmem>>, vector<1x4x64xf32>
    %198 = vector.shape_cast %197 : vector<1x4x64xf32> to vector<4x64xf32>
    %199 = vector.shape_cast %196 : vector<4x64xf32> to vector<1x4x64xf32>
    tpu.vector_store %arg9[%c0_157, %c12_158, %c0_159], %199 {strides = array<i32>} : memref<1x16x64xf32, #tpu.memory_space<vmem>>, vector<1x4x64xf32>,
    return
  }
  func.func @transform_0(%arg0: i32) -> (i32, i32, i32, i32, i32) {
    %c0_i32 = arith.constant 0 : i32
    %c0_i32_0 = arith.constant 0 : i32
    %c0_i32_1 = arith.constant 0 : i32
    %c0_i32_2 = arith.constant 0 : i32
    %c0_i32_3 = arith.constant 0 : i32
    return %arg0, %c0_i32, %c0_i32_0, %c0_i32_1, %c0_i32_2 : i32, i32, i32, i32, i32
  }
  func.func @transform_1(%arg0: i32) -> (i32, i32, i32) {
    %c0_i32 = arith.constant 0 : i32
    %c0_i32_0 = arith.constant 0 : i32
    %c0_i32_1 = arith.constant 0 : i32
    %c0_i32_2 = arith.constant 0 : i32
    return %c0_i32, %c0_i32_0, %c0_i32_1 : i32, i32, i32
  }
  func.func @transform_2(%arg0: i32) -> (i32, i32) {
    %c0_i32 = arith.constant 0 : i32
    %c0_i32_0 = arith.constant 0 : i32
    %c0_i32_1 = arith.constant 0 : i32
    return %c0_i32, %c0_i32_0 : i32, i32
  }
  func.func @transform_3(%arg0: i32) -> (i32, i32) {
    %c0_i32 = arith.constant 0 : i32
    %c0_i32_0 = arith.constant 0 : i32
    %c0_i32_1 = arith.constant 0 : i32
    return %c0_i32, %c0_i32_0 : i32, i32
  }
  func.func @transform_4(%arg0: i32) -> (i32, i32) {
    %c0_i32 = arith.constant 0 : i32
    %c0_i32_0 = arith.constant 0 : i32
    %c0_i32_1 = arith.constant 0 : i32
    return %c0_i32, %c0_i32_0 : i32, i32
  }
  func.func @transform_5(%arg0: i32) -> (i32, i32) {
    %c0_i32 = arith.constant 0 : i32
    %c0_i32_0 = arith.constant 0 : i32
    %c0_i32_1 = arith.constant 0 : i32
    return %c0_i32, %c0_i32_0 : i32, i32
  }
  func.func @transform_6(%arg0: i32) -> (i32, i32) {
    %c0_i32 = arith.constant 0 : i32
    %c0_i32_0 = arith.constant 0 : i32
    %c0_i32_1 = arith.constant 0 : i32
    return %c0_i32, %c0_i32_0 : i32, i32
  }
  func.func @transform_7(%arg0: i32) -> (i32, i32, i32) {
    %c0_i32 = arith.constant 0 : i32
    %c0_i32_0 = arith.constant 0 : i32
    %c0_i32_1 = arith.constant 0 : i32
    return %arg0, %c0_i32, %c0_i32_0 : i32, i32, i32
  }
  func.func @transform_8(%arg0: i32) -> (i32, i32, i32) {
    %c0_i32 = arith.constant 0 : i32
    %c0_i32_0 = arith.constant 0 : i32
    %c0_i32_1 = arith.constant 0 : i32
    return %arg0, %c0_i32, %c0_i32_0 : i32, i32, i32
  }
}

</mosaic_0001>

<bundles_post_ra>
// kernel: tpu_custom_call.1
= control target key start
LH: loop header
LB: loop body
LE: loop exit
PB: predicated region body
PF: predicated region fallthrough
CT: control target
= control target key end

     0   :  { %s3852_s0 = inlined_call_operand.vmem [shape: f32[2,4,2,4,128], index: 0, kind: input, shape index: {}]   ;;  %s3853_s1 = inlined_call_operand.vmem [shape: f32[2,128,64], index: 1, kind: input, shape index: {}]   ;;  %s3854_s2 = inlined_call_operand.vmem [shape: f32[1,64], index: 2, kind: input, shape index: {}]   ;;  %s3855_s3 = inlined_call_operand.vmem [shape: f32[64,64], index: 3, kind: input, shape index: {}]   ;;  %s3856_s4 = inlined_call_operand.vmem [shape: f32[1,64], index: 4, kind: input, shape index: {}]   ;;  %s3857_s5 = inlined_call_operand.vmem [shape: f32[64,64], index: 5, kind: input, shape index: {}]   ;;  %s3858_s6 = inlined_call_operand.vmem [shape: f32[1,64], index: 6, kind: input, shape index: {}]   ;;  %s3859_s7 = inlined_call_operand.hbm [shape: f32[2,16,64], index: 7, kind: output, shape index: {0}]   ;;  %s3860_s8 = inlined_call_operand.hbm [shape: f32[2,16,64], index: 8, kind: output, shape index: {1}]  }
   0x1   :  { %3868 = sst [smem:[#allocation11_spill]] %s3852_s0 }
   0x2   :  { %14 = vsyncpa [#allocation3], 0 }
   0x3   :  { %16 = vsyncpa [#allocation3 + $0x1], 0 }
   0x4   :  { %17 = vsyncpa [#allocation5], 0 }
   0x5   :  { %19 = vsyncpa [#allocation5 + $0x1], 0  ;;  %s2884_s27 = smov 0   ;;  %s2886_s28 = smov 0  }
   0x6   :  { %s2888_s29 = smov 0   ;;  %s2890_s30 = smov 0  }
   0x7 LB: > { %s2905_s9 = sadd.s32 4294967295, %s2831_s30   ;;  %s1935_s10 = sadd.s32 4294967294, %s2831_s30   ;;  %s2831_s30 = sphi %s2890_s30, %s3882_s30   ;;  %s2827_s29 = sphi %s2888_s29, %s3881_s29   ;;  %s2823_s28 = sphi %s2886_s28, %s3880_s28   ;;  %s2819_s27 = sphi %s2884_s27, %s3879_s27  }
   0x8   : > { %s2909_s11 = sadd.s32 1, %s2831_s30   ;;  %s184_s12 = sadd.s32 1, %s2827_s29 }
   0x9   : > { %s181_s13 = ssub.s32 %s2831_s30, %s2909_s11  ;;  %p194_p0 = scmp.ne.s32.totalorder %s2827_s29, %s2823_s28 }
   0xa   : > { %p182_p1 = scmp.eq.s32.totalorder %s181_s13, 0  ;;  %p195_p2 = scmp.eq.s32.totalorder %s2905_s9, 1 }
   0xb   : > { %p200_p3 = scmp.ne.s32.totalorder %s2823_s28, %s2819_s27  ;;  %p201_p4 = scmp.eq.s32.totalorder %s1935_s10, 1 }
   0xc   : > { %s2920_s14 = scalar_select %p182_p1, %s2827_s29, %s184_s12  }
   0xd   : > { %p2922_p5 = por %p195_p2, %p194_p0  ;;  %p2926_p6 = por %p201_p4, %p200_p3 }
   0xe   : > { %p1938_p7 = scmp.ge.s32.totalorder %s2831_s30, 1  ;;  %p271_p8 = scmp.lt.s32.totalorder %s2831_s30, 3 }
  0x10   : > { %p272_p9 = pnand %p1938_p7, %p271_p8 }
  0x12   : > { %275 = sbr.rel (%p272_p9) target bundleno = 2391 (0x957), region = 48 }
  0x17   : > { %v2935_v0 = vld [vmem:[%s3853_s1 + $0xf8] sm:$0xff]  ;;  %v3861_v2 = vmov 0.0   ;;  %v2947_v3 = vld [vmem:[%s3853_s1 + $0xf0] sm:$0xff]  ;;  %v2961_v5 = vld [vmem:[%s3853_s1 + $0xe8] sm:$0xff]  ;;  %p310_p10 = scmp.lt.s32.totalorder %s2905_s9, 1  ;;  %s3871_s0 = sld [smem:[#allocation11_spill]] }
  0x18   : > { %v2940_v1 = vld [vmem:[%s3853_s1 + $0x78] sm:$0xff]  ;;  %2253 = vmatprep.subr.mxu0 %v3861_v2  ;;  %2288 = vmatprep.subr.mxu1 %v3861_v2  ;;  %v2952_v4 = vld [vmem:[%s3853_s1 + $0x70] sm:$0xff]  ;;  %v2966_v6 = vld [vmem:[%s3853_s1 + $0x68] sm:$0xff]  ;;  %vm2834_vm0 = vmmov 0   ;;  %vm499_vm1 = vcmask 519168   ;;  %vm529_vm2 = vcmask 523264  }
  0x19   : > { %2254 = vmatpush3.msra.mxu0 %v2935_v0  ;;  %2289 = vmatpush3.msra.mxu1 %v2940_v1  ;;  %v2975_v7 = vld [vmem:[%s3853_s1 + $0xe0] sm:$0xff]  ;;  %v2989_v9 = vld [vmem:[%s3853_s1 + $0xd8] sm:$0xff]  ;;  %v3003_v11 = vld [vmem:[%s3853_s1 + $0xd0] sm:$0xff]  ;;  %s311_s26 = scalar_select %p310_p10, %s2905_s9, 1 }
  0x1a   : > { %2255 = vmatprep.subr.mxu0 %v3861_v2  ;;  %2290 = vmatprep.subr.mxu1 %v3861_v2  ;;  %v2980_v8 = vld [vmem:[%s3853_s1 + $0x60] sm:$0xff]  ;;  %v2994_v10 = vld [vmem:[%s3853_s1 + $0x58] sm:$0xff]  ;;  %v3008_v12 = vld [vmem:[%s3853_s1 + $0x50] sm:$0xff]  ;;  %s3404_s19 = sand.u32 1, %s2823_s28   ;;  %s2043_s21 = sshll.u32 %s2905_s9, 8 }
  0x1b   : > { %2256 = vmatpush3.msra.mxu0 %v2947_v3  ;;  %2291 = vmatpush3.msra.mxu1 %v2952_v4  ;;  %v3017_v13 = vld [vmem:[%s3853_s1 + $0xc8] sm:$0xff]  ;;  %v3031_v15 = vld [vmem:[%s3853_s1 + $0xc0] sm:$0xff]  ;;  %v3045_v17 = vld [vmem:[%s3853_s1 + $0xb8] sm:$0xff]  ;;  %s2042_s22 = sshll.u32 %s311_s26, 5  ;;  %s1939_s20 = sshll.u32 %s3404_s19, 4 }
  0x1c   : > { %2257 = vmatprep.subr.mxu0 %v3861_v2  ;;  %2292 = vmatprep.subr.mxu1 %v3861_v2  ;;  %v3022_v14 = vld [vmem:[%s3853_s1 + $0x48] sm:$0xff]  ;;  %v3036_v16 = vld [vmem:[%s3853_s1 + $0x40] sm:$0xff]  ;;  %v3050_v18 = vld [vmem:[%s3853_s1 + $0x38] sm:$0xff]  ;;  %s3419_s25 = scalar_lea.vmem [#allocation2], %s1939_s20  ;;  %s3423_s10 = scalar_lea.vmem [#allocation4], %s1939_s20 }
  0x1d   : > { %2258 = vmatpush3.msra.mxu0 %v2961_v5  ;;  %2293 = vmatpush3.msra.mxu1 %v2966_v6  ;;  %v3059_v19 = vld [vmem:[%s3853_s1 + $0xb0] sm:$0xff]  ;;  %v3074_v21 = vld [vmem:[%s3853_s1 + $0xa8] sm:$0xff]  ;;  %v3088_v23 = vld [vmem:[%s3853_s1 + $0xa0] sm:$0xff]  ;;  %s3143_s13 = scalar_lea.vmem %s3871_s0, %s2042_s22  ;;  %s1825_s20 = sshll.u32 %s3419_s25, 4  ;;  %s3765_s20 = int_to_ptr.vmem [resolvable:$true] %s1825_s20 }
  0x1e   : > { %2259 = vmatprep.subr.mxu0 %v3861_v2  ;;  %2294 = vmatprep.subr.mxu1 %v3861_v2  ;;  %v3064_v20 = vld [vmem:[%s3853_s1 + $0x30] sm:$0xff]  ;;  %v3079_v22 = vld [vmem:[%s3853_s1 + $0x28] sm:$0xff]  ;;  %v3093_v24 = vld [vmem:[%s3853_s1 + $0x20] sm:$0xff]  ;;  %s1841_s22 = sshll.u32 %s3423_s10, 4  ;;  %s3770_s26 = scalar_lea.hbm %s3859_s7, %s2043_s21  ;;  %s3774_s22 = int_to_ptr.vmem [resolvable:$true] %s1841_s22 }
  0x1f   : > { %2260 = vmatpush3.msra.mxu0 %v2975_v7  ;;  %2295 = vmatpush3.msra.mxu1 %v2980_v8  ;;  %v3103_v25 = vld [vmem:[%s3853_s1 + $0x98] sm:$0xff]  ;;  %v3117_v27 = vld [vmem:[%s3853_s1 + $0x90] sm:$0xff]  ;;  %v3131_v29 = vld [vmem:[%s3853_s1 + $0x88] sm:$0xff]  ;;  %s3779_s12 = scalar_lea.hbm %s3860_s8, %s2043_s21  ;;  %s1807_s17 = scalar_lea.sflag [#allocation3], %s3404_s19 }
  0x20   : > { %2261 = vmatprep.subr.mxu0 %v3861_v2  ;;  %2296 = vmatprep.subr.mxu1 %v3861_v2  ;;  %v3108_v26 = vld [vmem:[%s3853_s1 + $0x18] sm:$0xff]  ;;  %v3122_v28 = vld [vmem:[%s3853_s1 + $0x10] sm:$0xff]  ;;  %v3136_v30 = vld [vmem:[%s3853_s1 + $0x8] sm:$0xff]  ;;  %s2741_s18 = scalar_lea.vmem %s3765_s20, 256  ;;  %s2835_s23 = smov [#allocation2]  }
  0x21   : > { %2262 = vmatpush3.msra.mxu0 %v2989_v9  ;;  %2297 = vmatpush3.msra.mxu1 %v2994_v10  ;;  %v3150_v31 = vld [vmem:[%s3853_s1 + $0x80] sm:$0xff]  ;;  %v3186_v48 = vld [vmem:[%s3855_s3 + $0x38] sm:$0xff]  ;;  %v3198_v50 = vld [vmem:[%s3855_s3 + $0x30] sm:$0xff]  ;;  %p2742_p11 = scmp.ne.s32.totalorder %s3765_s20, %s2741_s18  ;;  %s2745_s24 = sshll.u32 %s2835_s23, 4  ;;  %s2746_s24 = int_to_ptr.vmem [resolvable:$false] %s2745_s24 }
  0x22   : > { %2263 = vmatprep.subr.mxu0 %v3861_v2  ;;  %2298 = vmatprep.subr.mxu1 %v3861_v2  ;;  %v3157_v32 = vld [vmem:[%s3853_s1] sm:$0xff]  ;;  %v3191_v49 = vld [vmem:[%s3857_s5 + $0x38] sm:$0xff]  ;;  %v3203_v51 = vld [vmem:[%s3857_s5 + $0x30] sm:$0xff]  ;;  %s2747_s0 = scalar_lea.vmem %s2746_s24, 512  ;;  %p2748_p0 = scmp.lt.s32.totalorder %s3765_s20, %s2746_s24 }
  0x23   : > { %2264 = vmatpush3.msra.mxu0 %v3003_v11  ;;  %2299 = vmatpush3.msra.mxu1 %v3008_v12  ;;  %v1943_v33 = vld [vmem:[%s3143_s13 + $0x4] sm:$0xf]  ;;  %v315_v34 = vld [vmem:[%s3143_s13] sm:$0xf]  ;;  %v3210_v52 = vld [vmem:[%s3855_s3 + $0x28] sm:$0xff]  ;;  %p2743_p12 = pnand %p2742_p11, %p2922_p5  ;;  %p2749_p1 = scmp.lt.s32.totalorder %s2747_s0, %s2741_s18 }
  0x24   : > { %2265 = vmatprep.subr.mxu0 %v3861_v2  ;;  %2300 = vmatprep.subr.mxu1 %v3861_v2  ;;  %v3178_v37 = vld [vmem:[%s3854_s2] ss:$0 sm:$0xff]  ;;  %v3215_v53 = vld [vmem:[%s3857_s5 + $0x28] sm:$0xff]  ;;  %v3238_v56 = vld [vmem:[%s3855_s3 + $0x18] sm:$0xff] }
  0x25   : > { %2266 = vmatpush3.msra.mxu0 %v3017_v13  ;;  %2301 = vmatpush3.msra.mxu1 %v3022_v14  ;;  %v3224_v54 = vld [vmem:[%s3855_s3 + $0x20] sm:$0xff]  ;;  %v3243_v57 = vld [vmem:[%s3857_s5 + $0x18] sm:$0xff]  ;;  %v3252_v58 = vld [vmem:[%s3855_s3 + $0x10] sm:$0xff]  ;;  %p2744_p13 = pneg %p2743_p12  ;;  %p2750_p2 = por %p2749_p1, %p2748_p0 }
  0x26   : > { %2267 = vmatprep.subr.mxu0 %v3861_v2  ;;  %2302 = vmatprep.subr.mxu1 %v3861_v2  ;;  %v3229_v55 = vld [vmem:[%s3857_s5 + $0x20] sm:$0xff]  ;;  %v3257_v59 = vld [vmem:[%s3857_s5 + $0x10] sm:$0xff]  ;;  %v3266_v60 = vld [vmem:[%s3855_s3 + $0x8] sm:$0xff] }
  0x27   : > { %2268 = vmatpush3.msra.mxu0 %v3031_v15  ;;  %2303 = vmatpush3.msra.mxu1 %v3036_v16  ;;  %v3271_v61 = vld [vmem:[%s3857_s5 + $0x8] sm:$0xff]  ;;  %v3280_v62 = vld [vmem:[%s3855_s3] sm:$0xff]  ;;  %p2751_p3 = pnand %p2750_p2, %p2744_p13 }
  0x28   : > { %2269 = vmatprep.subr.mxu0 %v3861_v2  ;;  %2304 = vmatprep.subr.mxu1 %v3861_v2  ;;  %v3285_v63 = vld [vmem:[%s3857_s5] sm:$0xff] }
  0x29   : > { %2270 = vmatpush3.msra.mxu0 %v3045_v17  ;;  %2305 = vmatpush3.msra.mxu1 %v3050_v18  ;;  %3872 = vst [vmem:[#allocation8_spill] sm:$0xff] %v3285_v63 }
  0x2a   : > { %2271 = vmatprep.subr.mxu0 %v3861_v2  ;;  %2306 = vmatprep.subr.mxu1 %v3861_v2 }
  0x2b   : > { %2272 = vmatpush3.msra.mxu0 %v3059_v19  ;;  %2307 = vmatpush3.msra.mxu1 %v3064_v20 }
  0x2c   : > { %2273 = vmatprep.subr.mxu0 %v3861_v2  ;;  %2308 = vmatprep.subr.mxu1 %v3861_v2 }
  0x2d   : > { %2274 = vmatpush3.msra.mxu0 %v3074_v21  ;;  %2309 = vmatpush3.msra.mxu1 %v3079_v22 }
  0x2e   : > { %2275 = vmatprep.subr.mxu0 %v3861_v2  ;;  %2310 = vmatprep.subr.mxu1 %v3861_v2 }
  0x2f   : > { %2276 = vmatpush3.msra.mxu0 %v3088_v23  ;;  %2311 = vmatpush3.msra.mxu1 %v3093_v24 }
  0x30   : > { %2277 = vmatprep.subr.mxu0 %v3861_v2  ;;  %2312 = vmatprep.subr.mxu1 %v3861_v2 }
  0x31   : > { %2278 = vmatpush3.msra.mxu0 %v3103_v25  ;;  %2313 = vmatpush3.msra.mxu1 %v3108_v26 }
  0x32   : > { %2279 = vmatprep.subr.mxu0 %v3861_v2  ;;  %2314 = vmatprep.subr.mxu1 %v3861_v2 }
  0x33   : > { %2280 = vmatpush3.msra.mxu0 %v3117_v27  ;;  %2315 = vmatpush3.msra.mxu1 %v3122_v28 }
  0x34   : > { %2281 = vmatprep.subr.mxu0 %v3861_v2  ;;  %2316 = vmatprep.subr.mxu1 %v3861_v2 }
  0x35   : > { %2282 = vmatpush3.msra.mxu0 %v3131_v29  ;;  %2317 = vmatpush3.msra.mxu1 %v3136_v30 }
  0x36   : > { %2283 = vmatprep.subr.mxu0 %v3861_v2  ;;  %2318 = vmatprep.subr.mxu1 %v3861_v2 }
  0x37   : > { %2284 = vmatpush3.msra.mxu0 %v3150_v31  ;;  %2285 = vmatprep.mubr.msk.f32.mxu0 %vm2834_vm0, %v3861_v2 }
  0x38   : > { %2319 = vmatpush3.msra.mxu1 %v3157_v32  ;;  %2320 = vmatprep.mubr.msk.f32.mxu1 %vm2834_vm0, %v3861_v2 }
  0x39   : > { %2286 = vmatmul.mubr.f32.vlgmr.msra.gmra.mxu0 %v1943_v33  ;;  %2321 = vmatmul.mubr.f32.vlgmr.msra.gmra.mxu1 %v315_v34 }
  0x3a   : > { %2323 = vmatprep.subr.mxu0 %v3861_v2  ;;  %2342 = vmatprep.subr.mxu1 %v3861_v2 }
  0x3b   : > { %2339 = vmatprep.mubr.msk.f32.mxu0 %vm2834_vm0, %v3861_v2  ;;  %2358 = vmatprep.mubr.msk.f32.mxu1 %vm2834_vm0, %v3861_v2 }
  0x3c   : > { %2324 = vmatpush3.msra.mxu0 %v3186_v48  ;;  %2343 = vmatpush3.msra.mxu1 %v3191_v49 }
  0x3d   : > { %2325 = vmatprep.subr.mxu0 %v3861_v2  ;;  %2344 = vmatprep.subr.mxu1 %v3861_v2 }
  0x3e   : > { %2326 = vmatpush3.msra.mxu0 %v3198_v50  ;;  %2345 = vmatpush3.msra.mxu1 %v3203_v51 }
  0x3f   : > { %2327 = vmatprep.subr.mxu0 %v3861_v2  ;;  %2346 = vmatprep.subr.mxu1 %v3861_v2 }
  0x40   : > { %2328 = vmatpush3.msra.mxu0 %v3210_v52  ;;  %2347 = vmatpush3.msra.mxu1 %v3215_v53 }
  0x41   : > { %2329 = vmatprep.subr.mxu0 %v3861_v2  ;;  %2348 = vmatprep.subr.mxu1 %v3861_v2 }
  0x42   : > { %2330 = vmatpush3.msra.mxu0 %v3224_v54  ;;  %2349 = vmatpush3.msra.mxu1 %v3229_v55 }
  0x43   : > { %2331 = vmatprep.subr.mxu0 %v3861_v2  ;;  %2350 = vmatprep.subr.mxu1 %v3861_v2 }
  0x44   : > { %2332 = vmatpush3.msra.mxu0 %v3238_v56  ;;  %2351 = vmatpush3.msra.mxu1 %v3243_v57 }
  0x45   : > { %2333 = vmatprep.subr.mxu0 %v3861_v2  ;;  %2352 = vmatprep.subr.mxu1 %v3861_v2 }
  0x46   : > { %2334 = vmatpush3.msra.mxu0 %v3252_v58  ;;  %2353 = vmatpush3.msra.mxu1 %v3257_v59 }
  0x47   : > { %2335 = vmatprep.subr.mxu0 %v3861_v2  ;;  %2354 = vmatprep.subr.mxu1 %v3861_v2 }
  0x48   : > { %2336 = vmatpush3.msra.mxu0 %v3266_v60  ;;  %2355 = vmatpush3.msra.mxu1 %v3271_v61 }
  0x49   : > { %2337 = vmatprep.subr.mxu0 %v3861_v2  ;;  %2356 = vmatprep.subr.mxu1 %v3861_v2 }
  0x4a   : > { %2338 = vmatpush3.msra.mxu0 %v3280_v62  ;;  %2357 = vmatpush3.msra.mxu1 %v3285_v63 }
  0x4b   : > { %2361 = vmatprep.subr.mxu0 %v3861_v2  ;;  %2396 = vmatprep.subr.mxu1 %v3861_v2 }
  0xf9   : > { %v417_v35 = vpop.f32.mrf.mxu0  ;;  %v487_v36 = vpop.f32.mrf.mxu1 }
  0xfa   : > { %v488_v38 = vadd.f32 %v487_v36, %v417_v35 }
  0xfb   : > { %v2287_v39 = vpop.f32.mrf.mxu0  ;;  %v2322_v40 = vpop.f32.mrf.mxu1 }
  0xfc   : > { %v498_v41 = vadd.f32 %v3178_v37, %v488_v38  ;;  %v1966_v39 = vld [vmem:[%s3143_s13 + $0xc] sm:$0xf]  ;;  %v1965_v40 = vld [vmem:[%s3143_s13 + $0x8] sm:$0xf] }
  0xfe   : > { %v500_v42 = vsel %vm499_vm1, %v498_v41, 0.0 }
  0xff   : > { %501 = vadd.xlane.f32.xlu0 %v500_v42  ;;  %v3415_v42 = vld [vmem:[%s3858_s6] ss:$0 sm:$0xff] }
 0x100   : > { %3874 = vst [vmem:[#allocation10_spill] sm:$0xff] %v3415_v42 }
 0x188   : > { %v502_v43 = vpop.xlane.xlu0 %501 }
 0x189   : > { %v504_v44 = vmul.f32 0.015625, %v502_v43 }
 0x18b   : > { %v505_v45 = vsub.f32 %v498_v41, %v504_v44  ;;  %v3410_v41 = vld [vmem:[%s3856_s4] ss:$0 sm:$0xff] }
 0x18c   : > { %3873 = vst [vmem:[#allocation9_spill] sm:$0xff] %v3410_v41 }
 0x18d   : > { %v506_v46 = vmul.f32 %v505_v45, %v505_v45 }
 0x18f   : > { %v507_v47 = vsel %vm499_vm1, %v506_v46, 0.0 }
 0x190   : > { %508 = vadd.xlane.f32.xlu0 %v507_v47 }
 0x219   : > { %v509_v33 = vpop.xlane.xlu0 %508 }
 0x21a   : > { %v510_v34 = vmul.f32 0.015625, %v509_v33 }
 0x21c   : > { %v511_v35 = vadd.f32 1e-05, %v510_v34 }
 0x21e   : > { %2733 = vrsqrt.f32 %v511_v35 }
 0x22b   : > { %v2734_v36 = vpop.eup %2733 }
 0x22c   : > { %v513_v38 = vmul.f32 %v2734_v36, %v505_v45 }
 0x22e   : > { %2340 = vmatmul.mubr.msk.f32.vlgmr.msra.gmra.mxu0 %vm529_vm2, %v513_v38  ;;  %2359 = vmatmul.mubr.msk.f32.vlgmr.msra.gmra.mxu1 %vm529_vm2, %v513_v38 }
 0x22f   : > { %2362 = vmatpush3.msra.mxu0 %v2935_v0  ;;  %2397 = vmatpush3.msra.mxu1 %v2940_v1 }
 0x230   : > { %2363 = vmatprep.subr.mxu0 %v3861_v2  ;;  %2398 = vmatprep.subr.mxu1 %v3861_v2 }
 0x231   : > { %2364 = vmatpush3.msra.mxu0 %v2947_v3  ;;  %2399 = vmatpush3.msra.mxu1 %v2952_v4 }
 0x232   : > { %2365 = vmatprep.subr.mxu0 %v3861_v2  ;;  %2400 = vmatprep.subr.mxu1 %v3861_v2 }
 0x233   : > { %2366 = vmatpush3.msra.mxu0 %v2961_v5  ;;  %2401 = vmatpush3.msra.mxu1 %v2966_v6 }
 0x234   : > { %2367 = vmatprep.subr.mxu0 %v3861_v2  ;;  %2402 = vmatprep.subr.mxu1 %v3861_v2 }
 0x235   : > { %2368 = vmatpush3.msra.mxu0 %v2975_v7  ;;  %2403 = vmatpush3.msra.mxu1 %v2980_v8 }
 0x236   : > { %2369 = vmatprep.subr.mxu0 %v3861_v2  ;;  %2404 = vmatprep.subr.mxu1 %v3861_v2 }
 0x237   : > { %2370 = vmatpush3.msra.mxu0 %v2989_v9  ;;  %2405 = vmatpush3.msra.mxu1 %v2994_v10 }
 0x238   : > { %2371 = vmatprep.subr.mxu0 %v3861_v2  ;;  %2406 = vmatprep.subr.mxu1 %v3861_v2 }
 0x239   : > { %2372 = vmatpush3.msra.mxu0 %v3003_v11  ;;  %2407 = vmatpush3.msra.mxu1 %v3008_v12 }
 0x23a   : > { %2373 = vmatprep.subr.mxu0 %v3861_v2  ;;  %2408 = vmatprep.subr.mxu1 %v3861_v2 }
 0x23b   : > { %2374 = vmatpush3.msra.mxu0 %v3017_v13  ;;  %2409 = vmatpush3.msra.mxu1 %v3022_v14 }
 0x23c   : > { %2375 = vmatprep.subr.mxu0 %v3861_v2  ;;  %2410 = vmatprep.subr.mxu1 %v3861_v2 }
 0x23d   : > { %2376 = vmatpush3.msra.mxu0 %v3031_v15  ;;  %2411 = vmatpush3.msra.mxu1 %v3036_v16 }
 0x23e   : > { %2377 = vmatprep.subr.mxu0 %v3861_v2  ;;  %2412 = vmatprep.subr.mxu1 %v3861_v2 }
 0x23f   : > { %2378 = vmatpush3.msra.mxu0 %v3045_v17  ;;  %2413 = vmatpush3.msra.mxu1 %v3050_v18 }
 0x240   : > { %2379 = vmatprep.subr.mxu0 %v3861_v2  ;;  %2414 = vmatprep.subr.mxu1 %v3861_v2 }
 0x241   : > { %2380 = vmatpush3.msra.mxu0 %v3059_v19  ;;  %2415 = vmatpush3.msra.mxu1 %v3064_v20 }
 0x242   : > { %2381 = vmatprep.subr.mxu0 %v3861_v2  ;;  %2416 = vmatprep.subr.mxu1 %v3861_v2 }
 0x243   : > { %2382 = vmatpush3.msra.mxu0 %v3074_v21  ;;  %2417 = vmatpush3.msra.mxu1 %v3079_v22 }
 0x244   : > { %2383 = vmatprep.subr.mxu0 %v3861_v2  ;;  %2418 = vmatprep.subr.mxu1 %v3861_v2 }
 0x245   : > { %2384 = vmatpush3.msra.mxu0 %v3088_v23  ;;  %2419 = vmatpush3.msra.mxu1 %v3093_v24 }
 0x246   : > { %2385 = vmatprep.subr.mxu0 %v3861_v2  ;;  %2420 = vmatprep.subr.mxu1 %v3861_v2 }
 0x247   : > { %2386 = vmatpush3.msra.mxu0 %v3103_v25  ;;  %2421 = vmatpush3.msra.mxu1 %v3108_v26 }
 0x248   : > { %2387 = vmatprep.subr.mxu0 %v3861_v2  ;;  %2422 = vmatprep.subr.mxu1 %v3861_v2 }
 0x249   : > { %2388 = vmatpush3.msra.mxu0 %v3117_v27  ;;  %2423 = vmatpush3.msra.mxu1 %v3122_v28 }
 0x24a   : > { %2389 = vmatprep.subr.mxu0 %v3861_v2  ;;  %2424 = vmatprep.subr.mxu1 %v3861_v2 }
 0x24b   : > { %2390 = vmatpush3.msra.mxu0 %v3131_v29  ;;  %2425 = vmatpush3.msra.mxu1 %v3136_v30 }
 0x24c   : > { %2391 = vmatprep.subr.mxu0 %v3861_v2  ;;  %2426 = vmatprep.subr.mxu1 %v3861_v2 }
 0x24d   : > { %2392 = vmatpush3.msra.mxu0 %v3150_v31  ;;  %2393 = vmatprep.mubr.msk.f32.mxu0 %vm2834_vm0, %v3861_v2 }
 0x24e   : > { %2427 = vmatpush3.msra.mxu1 %v3157_v32  ;;  %2428 = vmatprep.mubr.msk.f32.mxu1 %vm2834_vm0, %v3861_v2 }
 0x24f   : > { %2394 = vmatmul.mubr.f32.vlgmr.msra.gmra.mxu0 %v1966_v39  ;;  %2429 = vmatmul.mubr.f32.vlgmr.msra.gmra.mxu1 %v1965_v40 }
 0x250   : > { %2431 = vmatprep.subr.mxu0 %v3861_v2  ;;  %2450 = vmatprep.subr.mxu1 %v3861_v2 }
 0x251   : > { %2432 = vmatpush3.msra.mxu0 %v3186_v48  ;;  %2451 = vmatpush3.msra.mxu1 %v3191_v49 }
 0x252   : > { %2433 = vmatprep.subr.mxu0 %v3861_v2  ;;  %2452 = vmatprep.subr.mxu1 %v3861_v2 }
 0x253   : > { %2434 = vmatpush3.msra.mxu0 %v3198_v50  ;;  %2453 = vmatpush3.msra.mxu1 %v3203_v51 }
 0x254   : > { %2435 = vmatprep.subr.mxu0 %v3861_v2  ;;  %2454 = vmatprep.subr.mxu1 %v3861_v2 }
 0x255   : > { %2436 = vmatpush3.msra.mxu0 %v3210_v52  ;;  %2455 = vmatpush3.msra.mxu1 %v3215_v53 }
 0x256   : > { %2437 = vmatprep.subr.mxu0 %v3861_v2  ;;  %2456 = vmatprep.subr.mxu1 %v3861_v2 }
 0x257   : > { %2438 = vmatpush3.msra.mxu0 %v3224_v54  ;;  %2457 = vmatpush3.msra.mxu1 %v3229_v55 }
 0x258   : > { %2439 = vmatprep.subr.mxu0 %v3861_v2  ;;  %2458 = vmatprep.subr.mxu1 %v3861_v2 }
 0x259   : > { %2440 = vmatpush3.msra.mxu0 %v3238_v56  ;;  %2459 = vmatpush3.msra.mxu1 %v3243_v57 }
 0x25a   : > { %2441 = vmatprep.subr.mxu0 %v3861_v2  ;;  %2460 = vmatprep.subr.mxu1 %v3861_v2 }
 0x25b   : > { %2442 = vmatpush3.msra.mxu0 %v3252_v58  ;;  %2461 = vmatpush3.msra.mxu1 %v3257_v59 }
 0x25c   : > { %2443 = vmatprep.subr.mxu0 %v3861_v2  ;;  %2462 = vmatprep.subr.mxu1 %v3861_v2 }
 0x25d   : > { %2444 = vmatpush3.msra.mxu0 %v3266_v60  ;;  %2463 = vmatpush3.msra.mxu1 %v3271_v61 }
 0x25e   : > { %2445 = vmatprep.subr.mxu0 %v3861_v2  ;;  %2464 = vmatprep.subr.mxu1 %v3861_v2 }
 0x25f   : > { %2446 = vmatpush3.msra.mxu0 %v3280_v62  ;;  %2465 = vmatpush3.msra.mxu1 %v3285_v63 }
 0x260   : > { %2447 = vmatprep.mubr.msk.f32.mxu0 %vm2834_vm0, %v3861_v2  ;;  %2466 = vmatprep.mubr.msk.f32.mxu1 %vm2834_vm0, %v3861_v2 }
 0x261   : > { %2469 = vmatprep.subr.mxu0 %v3861_v2  ;;  %2504 = vmatprep.subr.mxu1 %v3861_v2 }
 0x2ee   : > { %v599_v43 = vpop.f32.mrf.mxu0  ;;  %v685_v44 = vpop.f32.mrf.mxu1 }
 0x2ef   : > { %v600_v45 = vadd.f32 %v3410_v41, %v599_v43  ;;  %v686_v46 = vadd.f32 %v3415_v42, %v685_v44 }
 0x2f0   : > { %v2341_v47 = vpop.f32.mrf.mxu0  ;;  %v2360_v33 = vpop.f32.mrf.mxu1 }
 0x2f1   : > { %603 = vst.msk [vmem:[%s3419_s25] sm:$0xf] %vm499_vm1, %v600_v45  ;;  %689 = vst.msk [vmem:[%s3423_s10] sm:$0xf] %vm499_vm1, %v686_v46 }
 0x30f   : > { %v792_v34 = vpop.f32.mrf.mxu0  ;;  %v862_v35 = vpop.f32.mrf.mxu1 }
 0x310   : > { %v863_v36 = vadd.f32 %v862_v35, %v792_v34  ;;  %v3875_v35 = vmov 0.0  }
 0x311   : > { %v2395_v38 = vpop.f32.mrf.mxu0  ;;  %v2430_v39 = vpop.f32.mrf.mxu1 }
 0x312   : > { %v873_v40 = vadd.f32 %v3178_v37, %v863_v36  ;;  %v2016_v36 = vld [vmem:[%s3853_s1 + $0x98] sm:$0xff]  ;;  %v2015_v39 = vld [vmem:[%s3853_s1 + $0x90] sm:$0xff] }
 0x313   : > { %v1439_v38 = vld [vmem:[%s3853_s1 + $0x18] sm:$0xff] }
 0x314   : > { %v874_v43 = vsel %vm499_vm1, %v873_v40, 0.0 }
 0x315   : > { %875 = vadd.xlane.f32.xlu1 %v874_v43  ;;  %v2014_v43 = vld [vmem:[%s3853_s1 + $0x88] sm:$0xff] }
 0x39e   : > { %v876_v44 = vpop.xlane.xlu1 %875 }
 0x39f   : > { %v877_v47 = vmul.f32 0.015625, %v876_v44  ;;  %v1437_v44 = vld [vmem:[%s3853_s1 + $0x8] sm:$0xff] }
 0x3a1   : > { %v878_v33 = vsub.f32 %v873_v40, %v877_v47  ;;  %v1438_v40 = vld [vmem:[%s3853_s1 + $0x10] sm:$0xff]  ;;  %v2013_v47 = vld [vmem:[%s3853_s1 + $0x80] sm:$0xff] }
 0x3a3   : > { %v879_v2 = vmul.f32 %v878_v33, %v878_v33 }
 0x3a5   : > { %v880_v45 = vsel %vm499_vm1, %v879_v2, 0.0  ;;  %v3876_v2 = vld [vmem:[#allocation8_spill] sm:$0xff] }
 0x3a6   : > { %881 = vadd.xlane.f32.xlu1 %v880_v45  ;;  %v2012_v45 = vld [vmem:[%s3143_s13 + $0x1c] sm:$0xf] }
 0x42f   : > { %v882_v42 = vpop.xlane.xlu1 %881 }
 0x430   : > { %v883_v41 = vmul.f32 0.015625, %v882_v42  ;;  %v1440_v42 = vld [vmem:[%s3853_s1 + $0x20] sm:$0xff] }
 0x432   : > { %v884_v46 = vadd.f32 1e-05, %v883_v41  ;;  %v2017_v41 = vld [vmem:[%s3853_s1 + $0xa0] sm:$0xff] }
 0x434   : > { %2735 = vrsqrt.f32 %v884_v46  ;;  %v2011_v46 = vld [vmem:[%s3143_s13 + $0x18] sm:$0xf] }
 0x441   : > { %v2736_v63 = vpop.eup %2735 }
 0x442   : > { %v886_v34 = vmul.f32 %v2736_v63, %v878_v33  ;;  %v1441_v63 = vld [vmem:[%s3853_s1 + $0x28] sm:$0xff]  ;;  %v1436_v33 = vld [vmem:[%s3853_s1] sm:$0xff] }
 0x444   : > { %2448 = vmatmul.mubr.msk.f32.vlgmr.msra.gmra.mxu0 %vm529_vm2, %v886_v34  ;;  %2467 = vmatmul.mubr.msk.f32.vlgmr.msra.gmra.mxu1 %vm529_vm2, %v886_v34 }
 0x445   : > { %2470 = vmatpush3.msra.mxu0 %v2935_v0  ;;  %2505 = vmatpush3.msra.mxu1 %v2940_v1  ;;  %v1989_v0 = vld [vmem:[%s3143_s13 + $0x14] sm:$0xf]  ;;  %v1988_v1 = vld [vmem:[%s3143_s13 + $0x10] sm:$0xf] }
 0x446   : > { %2471 = vmatprep.subr.mxu0 %v3875_v35  ;;  %2506 = vmatprep.subr.mxu1 %v3875_v35 }
 0x447   : > { %2472 = vmatpush3.msra.mxu0 %v2947_v3  ;;  %2507 = vmatpush3.msra.mxu1 %v2952_v4 }
 0x448   : > { %2473 = vmatprep.subr.mxu0 %v3875_v35  ;;  %2508 = vmatprep.subr.mxu1 %v3875_v35 }
 0x449   : > { %2474 = vmatpush3.msra.mxu0 %v2961_v5  ;;  %2509 = vmatpush3.msra.mxu1 %v2966_v6  ;;  %v3877_v5 = vld [vmem:[#allocation9_spill] sm:$0xff] }
 0x44a   : > { %2475 = vmatprep.subr.mxu0 %v3875_v35  ;;  %2510 = vmatprep.subr.mxu1 %v3875_v35 }
 0x44b   : > { %2476 = vmatpush3.msra.mxu0 %v2975_v7  ;;  %2511 = vmatpush3.msra.mxu1 %v2980_v8  ;;  %v3878_v7 = vld [vmem:[#allocation10_spill] sm:$0xff] }
 0x44c   : > { %2477 = vmatprep.subr.mxu0 %v3875_v35  ;;  %2512 = vmatprep.subr.mxu1 %v3875_v35 }
 0x44d   : > { %2478 = vmatpush3.msra.mxu0 %v2989_v9  ;;  %2513 = vmatpush3.msra.mxu1 %v2994_v10 }
 0x44e   : > { %2479 = vmatprep.subr.mxu0 %v3875_v35  ;;  %2514 = vmatprep.subr.mxu1 %v3875_v35 }
 0x44f   : > { %2480 = vmatpush3.msra.mxu0 %v3003_v11  ;;  %2515 = vmatpush3.msra.mxu1 %v3008_v12 }
 0x450   : > { %2481 = vmatprep.subr.mxu0 %v3875_v35  ;;  %2516 = vmatprep.subr.mxu1 %v3875_v35 }
 0x451   : > { %2482 = vmatpush3.msra.mxu0 %v3017_v13  ;;  %2517 = vmatpush3.msra.mxu1 %v3022_v14 }
 0x452   : > { %2483 = vmatprep.subr.mxu0 %v3875_v35  ;;  %2518 = vmatprep.subr.mxu1 %v3875_v35 }
 0x453   : > { %2484 = vmatpush3.msra.mxu0 %v3031_v15  ;;  %2519 = vmatpush3.msra.mxu1 %v3036_v16 }
 0x454   : > { %2485 = vmatprep.subr.mxu0 %v3875_v35  ;;  %2520 = vmatprep.subr.mxu1 %v3875_v35 }
 0x455   : > { %2486 = vmatpush3.msra.mxu0 %v3045_v17  ;;  %2521 = vmatpush3.msra.mxu1 %v3050_v18 }
 0x456   : > { %2487 = vmatprep.subr.mxu0 %v3875_v35  ;;  %2522 = vmatprep.subr.mxu1 %v3875_v35 }
 0x457   : > { %2488 = vmatpush3.msra.mxu0 %v3059_v19  ;;  %2523 = vmatpush3.msra.mxu1 %v3064_v20 }
 0x458   : > { %2489 = vmatprep.subr.mxu0 %v3875_v35  ;;  %2524 = vmatprep.subr.mxu1 %v3875_v35 }
 0x459   : > { %2490 = vmatpush3.msra.mxu0 %v3074_v21  ;;  %2525 = vmatpush3.msra.mxu1 %v3079_v22 }
 0x45a   : > { %2491 = vmatprep.subr.mxu0 %v3875_v35  ;;  %2526 = vmatprep.subr.mxu1 %v3875_v35 }
 0x45b   : > { %2492 = vmatpush3.msra.mxu0 %v3088_v23  ;;  %2527 = vmatpush3.msra.mxu1 %v3093_v24 }
 0x45c   : > { %2493 = vmatprep.subr.mxu0 %v3875_v35  ;;  %2528 = vmatprep.subr.mxu1 %v3875_v35 }
 0x45d   : > { %2494 = vmatpush3.msra.mxu0 %v3103_v25  ;;  %2529 = vmatpush3.msra.mxu1 %v3108_v26 }
 0x45e   : > { %2495 = vmatprep.subr.mxu0 %v3875_v35  ;;  %2530 = vmatprep.subr.mxu1 %v3875_v35 }
 0x45f   : > { %2496 = vmatpush3.msra.mxu0 %v3117_v27  ;;  %2531 = vmatpush3.msra.mxu1 %v3122_v28  ;;  %v2028_v28 = vld [vmem:[%s3853_s1 + $0xf8] sm:$0xff] }
 0x460   : > { %2497 = vmatprep.subr.mxu0 %v3875_v35  ;;  %2532 = vmatprep.subr.mxu1 %v3875_v35 }
 0x461   : > { %2498 = vmatpush3.msra.mxu0 %v3131_v29  ;;  %2533 = vmatpush3.msra.mxu1 %v3136_v30  ;;  %v1451_v29 = vld [vmem:[%s3853_s1 + $0x78] sm:$0xff]  ;;  %v2027_v30 = vld [vmem:[%s3853_s1 + $0xf0] sm:$0xff] }
 0x462   : > { %2499 = vmatprep.subr.mxu0 %v3875_v35  ;;  %2534 = vmatprep.subr.mxu1 %v3875_v35 }
 0x463   : > { %2500 = vmatpush3.msra.mxu0 %v3150_v31  ;;  %2501 = vmatprep.mubr.msk.f32.mxu0 %vm2834_vm0, %v3875_v35  ;;  %v1450_v31 = vld [vmem:[%s3853_s1 + $0x70] sm:$0xff] }
 0x464   : > { %2535 = vmatpush3.msra.mxu1 %v3157_v32  ;;  %2536 = vmatprep.mubr.msk.f32.mxu1 %vm2834_vm0, %v3875_v35  ;;  %v2026_v32 = vld [vmem:[%s3853_s1 + $0xe8] sm:$0xff] }
 0x465   : > { %2502 = vmatmul.mubr.f32.vlgmr.msra.gmra.mxu0 %v1989_v0  ;;  %2537 = vmatmul.mubr.f32.vlgmr.msra.gmra.mxu1 %v1988_v1 }
 0x466   : > { %2539 = vmatprep.subr.mxu0 %v3875_v35  ;;  %2558 = vmatprep.subr.mxu1 %v3875_v35 }
 0x467   : > { %2540 = vmatpush3.msra.mxu0 %v3186_v48  ;;  %2559 = vmatpush3.msra.mxu1 %v3191_v49  ;;  %v2025_v48 = vld [vmem:[%s3853_s1 + $0xe0] sm:$0xff] }
 0x468   : > { %2541 = vmatprep.subr.mxu0 %v3875_v35  ;;  %2560 = vmatprep.subr.mxu1 %v3875_v35  ;;  %v1448_v49 = vld [vmem:[%s3853_s1 + $0x60] sm:$0xff] }
 0x469   : > { %2542 = vmatpush3.msra.mxu0 %v3198_v50  ;;  %2561 = vmatpush3.msra.mxu1 %v3203_v51  ;;  %v2024_v50 = vld [vmem:[%s3853_s1 + $0xd8] sm:$0xff] }
 0x46a   : > { %2543 = vmatprep.subr.mxu0 %v3875_v35  ;;  %2562 = vmatprep.subr.mxu1 %v3875_v35  ;;  %v1447_v51 = vld [vmem:[%s3853_s1 + $0x58] sm:$0xff] }
 0x46b   : > { %2544 = vmatpush3.msra.mxu0 %v3210_v52  ;;  %2563 = vmatpush3.msra.mxu1 %v3215_v53  ;;  %v2023_v52 = vld [vmem:[%s3853_s1 + $0xd0] sm:$0xff] }
 0x46c   : > { %2545 = vmatprep.subr.mxu0 %v3875_v35  ;;  %2564 = vmatprep.subr.mxu1 %v3875_v35  ;;  %v1446_v53 = vld [vmem:[%s3853_s1 + $0x50] sm:$0xff] }
 0x46d   : > { %2546 = vmatpush3.msra.mxu0 %v3224_v54  ;;  %2565 = vmatpush3.msra.mxu1 %v3229_v55  ;;  %v2022_v54 = vld [vmem:[%s3853_s1 + $0xc8] sm:$0xff] }
 0x46e   : > { %2547 = vmatprep.subr.mxu0 %v3875_v35  ;;  %2566 = vmatprep.subr.mxu1 %v3875_v35  ;;  %v1445_v55 = vld [vmem:[%s3853_s1 + $0x48] sm:$0xff] }
 0x46f   : > { %2548 = vmatpush3.msra.mxu0 %v3238_v56  ;;  %2567 = vmatpush3.msra.mxu1 %v3243_v57  ;;  %v2021_v56 = vld [vmem:[%s3853_s1 + $0xc0] sm:$0xff] }
 0x470   : > { %2549 = vmatprep.subr.mxu0 %v3875_v35  ;;  %2568 = vmatprep.subr.mxu1 %v3875_v35  ;;  %v1444_v57 = vld [vmem:[%s3853_s1 + $0x40] sm:$0xff] }
 0x471   : > { %2550 = vmatpush3.msra.mxu0 %v3252_v58  ;;  %2569 = vmatpush3.msra.mxu1 %v3257_v59  ;;  %v2020_v58 = vld [vmem:[%s3853_s1 + $0xb8] sm:$0xff] }
 0x472   : > { %2551 = vmatprep.subr.mxu0 %v3875_v35  ;;  %2570 = vmatprep.subr.mxu1 %v3875_v35  ;;  %v1443_v59 = vld [vmem:[%s3853_s1 + $0x38] sm:$0xff] }
 0x473   : > { %2552 = vmatpush3.msra.mxu0 %v3266_v60  ;;  %2571 = vmatpush3.msra.mxu1 %v3271_v61  ;;  %v2019_v60 = vld [vmem:[%s3853_s1 + $0xb0] sm:$0xff] }
 0x474   : > { %2553 = vmatprep.subr.mxu0 %v3875_v35  ;;  %2572 = vmatprep.subr.mxu1 %v3875_v35  ;;  %v1442_v61 = vld [vmem:[%s3853_s1 + $0x30] sm:$0xff] }
 0x475   : > { %2554 = vmatpush3.msra.mxu0 %v3280_v62  ;;  %2573 = vmatpush3.msra.mxu1 %v3876_v2  ;;  %v2018_v62 = vld [vmem:[%s3853_s1 + $0xa8] sm:$0xff] }
 0x476   : > { %2555 = vmatprep.mubr.msk.f32.mxu0 %vm2834_vm0, %v3875_v35  ;;  %2574 = vmatprep.mubr.msk.f32.mxu1 %vm2834_vm0, %v3875_v35 }
 0x477   : > { %2577 = vmatprep.subr.mxu0 %v3875_v35  ;;  %2612 = vmatprep.subr.mxu1 %v3875_v35 }
 0x504   : > { %v971_v3 = vpop.f32.mrf.mxu0  ;;  %v1057_v4 = vpop.f32.mrf.mxu1 }
 0x505   : > { %v972_v6 = vadd.f32 %v3877_v5, %v971_v3  ;;  %v1058_v8 = vadd.f32 %v3878_v7, %v1057_v4 }
 0x506   : > { %v2449_v9 = vpop.f32.mrf.mxu0  ;;  %v2468_v10 = vpop.f32.mrf.mxu1 }
 0x507   : > { %975 = vst.msk [vmem:[%s3419_s25 + $0x4] sm:$0xf] %vm499_vm1, %v972_v6  ;;  %1061 = vst.msk [vmem:[%s3423_s10 + $0x4] sm:$0xf] %vm499_vm1, %v1058_v8  ;;  %v2029_v9 = vld [vmem:[%s3854_s2] ss:$0 sm:$0xff] }
 0x525   : > { %v1164_v11 = vpop.f32.mrf.mxu0  ;;  %v1234_v12 = vpop.f32.mrf.mxu1 }
 0x526   : > { %v1235_v13 = vadd.f32 %v1234_v12, %v1164_v11 }
 0x527   : > { %v2503_v14 = vpop.f32.mrf.mxu0  ;;  %v2538_v15 = vpop.f32.mrf.mxu1 }
 0x528   : > { %v1245_v16 = vadd.f32 %v3178_v37, %v1235_v13  ;;  %v1449_v37 = vld [vmem:[%s3853_s1 + $0x68] sm:$0xff] }
 0x52a   : > { %v1246_v17 = vsel %vm499_vm1, %v1245_v16, 0.0 }
 0x52b   : > { %1247 = vadd.xlane.f32.xlu0 %v1246_v17 }
 0x5b4   : > { %v1248_v18 = vpop.xlane.xlu0 %1247 }
 0x5b5   : > { %v1249_v19 = vmul.f32 0.015625, %v1248_v18 }
 0x5b7   : > { %v1250_v20 = vsub.f32 %v1245_v16, %v1249_v19 }
 0x5b9   : > { %v1251_v21 = vmul.f32 %v1250_v20, %v1250_v20 }
 0x5bb   : > { %v1252_v22 = vsel %vm499_vm1, %v1251_v21, 0.0  ;;  %v1727_v21 = vld [vmem:[%s3857_s5 + $0x38] sm:$0xff] }
 0x5bc   : > { %1253 = vadd.xlane.f32.xlu1 %v1252_v22  ;;  %v1637_v22 = vld [vmem:[%s3855_s3 + $0x30] sm:$0xff] }
 0x645   : > { %v1254_v23 = vpop.xlane.xlu1 %1253 }
 0x646   : > { %v1255_v24 = vmul.f32 0.015625, %v1254_v23  ;;  %v1726_v23 = vld [vmem:[%s3857_s5 + $0x30] sm:$0xff] }
 0x648   : > { %v1256_v25 = vadd.f32 1e-05, %v1255_v24  ;;  %v1636_v24 = vld [vmem:[%s3855_s3 + $0x28] sm:$0xff] }
 0x64a   : > { %2737 = vrsqrt.f32 %v1256_v25  ;;  %v1725_v25 = vld [vmem:[%s3857_s5 + $0x28] sm:$0xff] }
 0x657   : > { %v2738_v26 = vpop.eup %2737 }
 0x658   : > { %v1258_v27 = vmul.f32 %v2738_v26, %v1250_v20  ;;  %v1638_v20 = vld [vmem:[%s3855_s3 + $0x38] sm:$0xff]  ;;  %v1635_v26 = vld [vmem:[%s3855_s3 + $0x20] sm:$0xff] }
 0x65a   : > { %2556 = vmatmul.mubr.msk.f32.vlgmr.msra.gmra.mxu0 %vm529_vm2, %v1258_v27  ;;  %2575 = vmatmul.mubr.msk.f32.vlgmr.msra.gmra.mxu1 %vm529_vm2, %v1258_v27  ;;  %v1724_v27 = vld [vmem:[%s3857_s5 + $0x20] sm:$0xff] }
 0x65b   : > { %2578 = vmatpush3.msra.mxu0 %v2028_v28  ;;  %2613 = vmatpush3.msra.mxu1 %v1451_v29  ;;  %v1634_v28 = vld [vmem:[%s3855_s3 + $0x18] sm:$0xff] }
 0x65c   : > { %2579 = vmatprep.subr.mxu0 %v3875_v35  ;;  %2614 = vmatprep.subr.mxu1 %v3875_v35  ;;  %v1723_v29 = vld [vmem:[%s3857_s5 + $0x18] sm:$0xff] }
 0x65d   : > { %2580 = vmatpush3.msra.mxu0 %v2027_v30  ;;  %2615 = vmatpush3.msra.mxu1 %v1450_v31  ;;  %v1633_v30 = vld [vmem:[%s3855_s3 + $0x10] sm:$0xff] }
 0x65e   : > { %2581 = vmatprep.subr.mxu0 %v3875_v35  ;;  %2616 = vmatprep.subr.mxu1 %v3875_v35  ;;  %v1722_v31 = vld [vmem:[%s3857_s5 + $0x10] sm:$0xff] }
 0x65f   : > { %2582 = vmatpush3.msra.mxu0 %v2026_v32  ;;  %2617 = vmatpush3.msra.mxu1 %v1449_v37  ;;  %v1632_v32 = vld [vmem:[%s3855_s3 + $0x8] sm:$0xff] }
 0x660   : > { %2583 = vmatprep.subr.mxu0 %v3875_v35  ;;  %2618 = vmatprep.subr.mxu1 %v3875_v35  ;;  %v1721_v37 = vld [vmem:[%s3857_s5 + $0x8] sm:$0xff] }
 0x661   : > { %2584 = vmatpush3.msra.mxu0 %v2025_v48  ;;  %2619 = vmatpush3.msra.mxu1 %v1448_v49  ;;  %v1631_v48 = vld [vmem:[%s3855_s3] sm:$0xff] }
 0x662   : > { %2585 = vmatprep.subr.mxu0 %v3875_v35  ;;  %2620 = vmatprep.subr.mxu1 %v3875_v35  ;;  %v1720_v49 = vld [vmem:[%s3857_s5] sm:$0xff] }
 0x663   : > { %2586 = vmatpush3.msra.mxu0 %v2024_v50  ;;  %2621 = vmatpush3.msra.mxu1 %v1447_v51 }
 0x664   : > { %2587 = vmatprep.subr.mxu0 %v3875_v35  ;;  %2622 = vmatprep.subr.mxu1 %v3875_v35 }
 0x665   : > { %2588 = vmatpush3.msra.mxu0 %v2023_v52  ;;  %2623 = vmatpush3.msra.mxu1 %v1446_v53 }
 0x666   : > { %2589 = vmatprep.subr.mxu0 %v3875_v35  ;;  %2624 = vmatprep.subr.mxu1 %v3875_v35 }
 0x667   : > { %2590 = vmatpush3.msra.mxu0 %v2022_v54  ;;  %2625 = vmatpush3.msra.mxu1 %v1445_v55 }
 0x668   : > { %2591 = vmatprep.subr.mxu0 %v3875_v35  ;;  %2626 = vmatprep.subr.mxu1 %v3875_v35 }
 0x669   : > { %2592 = vmatpush3.msra.mxu0 %v2021_v56  ;;  %2627 = vmatpush3.msra.mxu1 %v1444_v57 }
 0x66a   : > { %2593 = vmatprep.subr.mxu0 %v3875_v35  ;;  %2628 = vmatprep.subr.mxu1 %v3875_v35 }
 0x66b   : > { %2594 = vmatpush3.msra.mxu0 %v2020_v58  ;;  %2629 = vmatpush3.msra.mxu1 %v1443_v59 }
 0x66c   : > { %2595 = vmatprep.subr.mxu0 %v3875_v35  ;;  %2630 = vmatprep.subr.mxu1 %v3875_v35 }
 0x66d   : > { %2596 = vmatpush3.msra.mxu0 %v2019_v60  ;;  %2631 = vmatpush3.msra.mxu1 %v1442_v61 }
 0x66e   : > { %2597 = vmatprep.subr.mxu0 %v3875_v35  ;;  %2632 = vmatprep.subr.mxu1 %v3875_v35 }
 0x66f   : > { %2598 = vmatpush3.msra.mxu0 %v2018_v62  ;;  %2633 = vmatpush3.msra.mxu1 %v1441_v63 }
 0x670   : > { %2599 = vmatprep.subr.mxu0 %v3875_v35  ;;  %2634 = vmatprep.subr.mxu1 %v3875_v35 }
 0x671   : > { %2600 = vmatpush3.msra.mxu0 %v2017_v41  ;;  %2635 = vmatpush3.msra.mxu1 %v1440_v42 }
 0x672   : > { %2601 = vmatprep.subr.mxu0 %v3875_v35  ;;  %2636 = vmatprep.subr.mxu1 %v3875_v35 }
 0x673   : > { %2602 = vmatpush3.msra.mxu0 %v2016_v36  ;;  %2637 = vmatpush3.msra.mxu1 %v1439_v38 }
 0x674   : > { %2603 = vmatprep.subr.mxu0 %v3875_v35  ;;  %2638 = vmatprep.subr.mxu1 %v3875_v35 }
 0x675   : > { %2604 = vmatpush3.msra.mxu0 %v2015_v39  ;;  %2639 = vmatpush3.msra.mxu1 %v1438_v40 }
 0x676   : > { %2605 = vmatprep.subr.mxu0 %v3875_v35  ;;  %2640 = vmatprep.subr.mxu1 %v3875_v35 }
 0x677   : > { %2606 = vmatpush3.msra.mxu0 %v2014_v43  ;;  %2641 = vmatpush3.msra.mxu1 %v1437_v44 }
 0x678   : > { %2607 = vmatprep.subr.mxu0 %v3875_v35  ;;  %2642 = vmatprep.subr.mxu1 %v3875_v35 }
 0x679   : > { %2608 = vmatpush3.msra.mxu0 %v2013_v47  ;;  %2609 = vmatprep.mubr.msk.f32.mxu0 %vm2834_vm0, %v3875_v35 }
 0x67a   : > { %2643 = vmatpush3.msra.mxu1 %v1436_v33  ;;  %2644 = vmatprep.mubr.msk.f32.mxu1 %vm2834_vm0, %v3875_v35 }
 0x67b   : > { %2610 = vmatmul.mubr.f32.vlgmr.msra.gmra.mxu0 %v2012_v45  ;;  %2645 = vmatmul.mubr.f32.vlgmr.msra.gmra.mxu1 %v2011_v46 }
 0x67c   : > { %2647 = vmatprep.subr.mxu0 %v3875_v35  ;;  %2666 = vmatprep.subr.mxu1 %v3875_v35 }
 0x67d   : > { %2663 = vmatprep.mubr.msk.f32.mxu0 %vm2834_vm0, %v3875_v35  ;;  %2682 = vmatprep.mubr.msk.f32.mxu1 %vm2834_vm0, %v3875_v35 }
 0x67e   : > { %2648 = vmatpush3.msra.mxu0 %v1638_v20  ;;  %2667 = vmatpush3.msra.mxu1 %v1727_v21 }
 0x67f   : > { %2649 = vmatprep.subr.mxu0 %v3875_v35  ;;  %2668 = vmatprep.subr.mxu1 %v3875_v35 }
 0x680   : > { %2650 = vmatpush3.msra.mxu0 %v1637_v22  ;;  %2669 = vmatpush3.msra.mxu1 %v1726_v23 }
 0x681   : > { %2651 = vmatprep.subr.mxu0 %v3875_v35  ;;  %2670 = vmatprep.subr.mxu1 %v3875_v35 }
 0x682   : > { %2652 = vmatpush3.msra.mxu0 %v1636_v24  ;;  %2671 = vmatpush3.msra.mxu1 %v1725_v25 }
 0x683   : > { %2653 = vmatprep.subr.mxu0 %v3875_v35  ;;  %2672 = vmatprep.subr.mxu1 %v3875_v35 }
 0x684   : > { %2654 = vmatpush3.msra.mxu0 %v1635_v26  ;;  %2673 = vmatpush3.msra.mxu1 %v1724_v27 }
 0x685   : > { %2655 = vmatprep.subr.mxu0 %v3875_v35  ;;  %2674 = vmatprep.subr.mxu1 %v3875_v35 }
 0x686   : > { %2656 = vmatpush3.msra.mxu0 %v1634_v28  ;;  %2675 = vmatpush3.msra.mxu1 %v1723_v29 }
 0x687   : > { %2657 = vmatprep.subr.mxu0 %v3875_v35  ;;  %2676 = vmatprep.subr.mxu1 %v3875_v35 }
 0x688   : > { %2658 = vmatpush3.msra.mxu0 %v1633_v30  ;;  %2677 = vmatpush3.msra.mxu1 %v1722_v31 }
 0x689   : > { %2659 = vmatprep.subr.mxu0 %v3875_v35  ;;  %2678 = vmatprep.subr.mxu1 %v3875_v35 }
 0x68a   : > { %2660 = vmatpush3.msra.mxu0 %v1632_v32  ;;  %2679 = vmatpush3.msra.mxu1 %v1721_v37 }
 0x68b   : > { %2661 = vmatprep.subr.mxu0 %v3875_v35  ;;  %2680 = vmatprep.subr.mxu1 %v3875_v35 }
 0x68c   : > { %2662 = vmatpush3.msra.mxu0 %v1631_v48  ;;  %2681 = vmatpush3.msra.mxu1 %v1720_v49 }
 0x71a   : > { %v1343_v34 = vpop.f32.mrf.mxu0  ;;  %v1429_v0 = vpop.f32.mrf.mxu1 }
 0x71b   : > { %v1344_v1 = vadd.f32 %v3877_v5, %v1343_v34  ;;  %v1430_v2 = vadd.f32 %v3878_v7, %v1429_v0 }
 0x71c   : > { %v2557_v3 = vpop.f32.mrf.mxu0  ;;  %v2576_v4 = vpop.f32.mrf.mxu1 }
 0x71d   : > { %1347 = vst.msk [vmem:[%s3419_s25 + $0x8] sm:$0xf] %vm499_vm1, %v1344_v1  ;;  %1433 = vst.msk [vmem:[%s3423_s10 + $0x8] sm:$0xf] %vm499_vm1, %v1430_v2 }
 0x73b   : > { %v1536_v6 = vpop.f32.mrf.mxu0  ;;  %v1606_v8 = vpop.f32.mrf.mxu1 }
 0x73c   : > { %v1607_v10 = vadd.f32 %v1606_v8, %v1536_v6 }
 0x73d   : > { %v2611_v11 = vpop.f32.mrf.mxu0  ;;  %v2646_v12 = vpop.f32.mrf.mxu1 }
 0x73e   : > { %v1617_v13 = vadd.f32 %v2029_v9, %v1607_v10 }
 0x740   : > { %v1618_v14 = vsel %vm499_vm1, %v1617_v13, 0.0 }
 0x741   : > { %1619 = vadd.xlane.f32.xlu0 %v1618_v14 }
 0x7ca   : > { %v1620_v15 = vpop.xlane.xlu0 %1619 }
 0x7cb   : > { %v1621_v16 = vmul.f32 0.015625, %v1620_v15 }
 0x7cd   : > { %v1622_v17 = vsub.f32 %v1617_v13, %v1621_v16 }
 0x7cf   : > { %v1623_v18 = vmul.f32 %v1622_v17, %v1622_v17 }
 0x7d1   : > { %v1624_v19 = vsel %vm499_vm1, %v1623_v18, 0.0 }
 0x7d2   : > { %1625 = vadd.xlane.f32.xlu1 %v1624_v19 }
 0x85b   : > { %v1626_v50 = vpop.xlane.xlu1 %1625 }
 0x85c   : > { %v1627_v51 = vmul.f32 0.015625, %v1626_v50 }
 0x85e   : > { %v1628_v52 = vadd.f32 1e-05, %v1627_v51 }
 0x860   : > { %2739 = vrsqrt.f32 %v1628_v52 }
 0x86d   : > { %v2740_v53 = vpop.eup %2739 }
 0x86e   : > { %v1630_v54 = vmul.f32 %v2740_v53, %v1622_v17 }
 0x870   : > { %2664 = vmatmul.mubr.msk.f32.vlgmr.msra.gmra.mxu0 %vm529_vm2, %v1630_v54  ;;  %2683 = vmatmul.mubr.msk.f32.vlgmr.msra.gmra.mxu1 %vm529_vm2, %v1630_v54 }
 0x930   : > { %v1715_v35 = vpop.f32.mrf.mxu0  ;;  %v1801_v55 = vpop.f32.mrf.mxu1 }
 0x931   : > { %v1716_v56 = vadd.f32 %v3877_v5, %v1715_v35  ;;  %v1802_v57 = vadd.f32 %v3878_v7, %v1801_v55 }
 0x932   : > { %v2665_v58 = vpop.f32.mrf.mxu0  ;;  %v2684_v59 = vpop.f32.mrf.mxu1 }
 0x933   : > { %1719 = vst.msk [vmem:[%s3419_s25 + $0xc] sm:$0xf] %vm499_vm1, %v1716_v56  ;;  %1805 = vst.msk [vmem:[%s3423_s10 + $0xc] sm:$0xf] %vm499_vm1, %v1802_v57 }
 0x934   : > { %2754 = shalt.err (!%p2751_p3)
}
 0x935   : > { %s2755_s25 = scalar_lea.hbm %s3770_s26, 256  ;;  %s2759_s9 = scalar_lea.hbm %s3859_s7, 512 }
 0x936   : > { %p2756_p4 = scmp.ne.s32.totalorder %s3770_s26, %s2755_s25  ;;  %p2760_p9 = scmp.lt.s32.totalorder %s3770_s26, %s3859_s7 }
 0x937   : > { %p2761_p10 = scmp.lt.s32.totalorder %s2759_s9, %s2755_s25 }
 0x938   : > { %p2757_p7 = pnand %p2756_p4, %p2922_p5 }
 0x939   : > { %p2762_p11 = por %p2761_p10, %p2760_p9 }
 0x93a   : > { %p2758_p8 = pneg %p2757_p7 }
 0x93c   : > { %p2763_p12 = pnand %p2762_p11, %p2758_p8 }
 0x93e   : > { %2766 = shalt.err (!%p2763_p12)
}
 0x93f   : > { %s2836_s0 = smov 128   ;;  %s2837_s18 = smov 8  }
 0x940   : > { %2685 = dma.vmem_to_hbm [thread:$0]  (%p2922_p5), %s3765_s20, 256, %s3770_s26, %s1807_s17, %s2836_s0, %s2836_s0, %s2837_s18  }
 0x941   : > { %s1812_s24 = scalar_lea.sflag [#allocation5], %s3404_s19  ;;  %s2767_s25 = scalar_lea.vmem %s3774_s22, 256 }
 0x942   : > { %p2768_p13 = scmp.ne.s32.totalorder %s3774_s22, %s2767_s25  ;;  %s2838_s10 = smov [#allocation4]  }
 0x943   : > { %s2771_s21 = sshll.u32 %s2838_s10, 4  ;;  %s2772_s21 = int_to_ptr.vmem [resolvable:$false] %s2771_s21 }
 0x944   : > { %p2769_p0 = pnand %p2768_p13, %p2922_p5  ;;  %s2773_s9 = scalar_lea.vmem %s2772_s21, 512 }
 0x945   : > { %p2774_p2 = scmp.lt.s32.totalorder %s3774_s22, %s2772_s21  ;;  %p2775_p3 = scmp.lt.s32.totalorder %s2773_s9, %s2767_s25 }
 0x946   : > { %p2770_p1 = pneg %p2769_p0 }
 0x947   : > { %p2776_p4 = por %p2775_p3, %p2774_p2 }
 0x949   : > { %p2777_p7 = pnand %p2776_p4, %p2770_p1 }
 0x94b   : > { %2780 = shalt.err (!%p2777_p7)
}
 0x94c   : > { %s2781_s20 = scalar_lea.hbm %s3779_s12, 256  ;;  %s2785_s17 = scalar_lea.hbm %s3860_s8, 512 }
 0x94d   : > { %p2782_p8 = scmp.ne.s32.totalorder %s3779_s12, %s2781_s20  ;;  %p2786_p11 = scmp.lt.s32.totalorder %s3779_s12, %s3860_s8 }
 0x94e   : > { %p2787_p12 = scmp.lt.s32.totalorder %s2785_s17, %s2781_s20 }
 0x94f   : > { %p2783_p9 = pnand %p2782_p8, %p2922_p5 }
 0x950   : > { %p2788_p13 = por %p2787_p12, %p2786_p11 }
 0x951   : > { %p2784_p10 = pneg %p2783_p9 }
 0x953   : > { %p2789_p0 = pnand %p2788_p13, %p2784_p10 }
 0x955   : > { %2792 = shalt.err (!%p2789_p0)
}
 0x956   : > { %2686 = dma.vmem_to_hbm [thread:$0]  (%p2922_p5), %s3774_s22, 256, %s3779_s12, %s1812_s24, %s2836_s0, %s2836_s0, %s2837_s18  }
 0x957 PF: > { %p2696_p1 = scmp.ge.s32.totalorder %s2831_s30, 2  ;;  %s1856_s25 = sand.u32 1, %s2819_s27  }
 0x958   : > { %s1857_s10 = scalar_lea.sflag [#allocation3], %s1856_s25 }
 0x959   : > { %p2690_p2 = pnand %p2696_p1, %p2926_p6 }
 0x95b   : > { %p2691_p3 = pneg %p2690_p2 }
 0x95d   : > { %2810 = dma.done.wait (%p2691_p3), %s1857_s10, 256  }
 0x95e   : > { %2812 = vsyncadd (%p2691_p3), %s1857_s10, 4294967040  ;;  %s1866_s21 = scalar_lea.sflag [#allocation5], %s1856_s25 }
 0x95f   : > { %2814 = dma.done.wait (%p2691_p3), %s1866_s21, 256  }
 0x960   : > { %2816 = vsyncadd (%p2691_p3), %s1866_s21, 4294967040  ;;  %p22_p5 = scmp.ge.s32.totalorder %s2909_s11, 4   ;;  %s3879_s27 = smov %s2823_s28 }
 0x961   : > { %s3880_s28 = smov %s2827_s29  ;;  %s3881_s29 = smov %s2920_s14 }
 0x962   : > { %s3882_s30 = smov %s2909_s11  ;;  %24 = sbr.rel (!%p22_p5) target bundleno = 7 (0x7), region = 108 }
 0x967   :  { %1871 = vsyncpa [#allocation3], 1 }
 0x968   :  { %1873 = vsyncpa [#allocation3 + $0x1], 1 }
 0x969   :  { %1874 = vsyncpa [#allocation5], 1 }
 0x96a   :  { %1876 = vsyncpa [#allocation5 + $0x1], 1 }

</bundles_post_ra>
